<compile_context>
chip_gen: v7x
topology: tpu7x:2x2x1
jax: 0.10.0
libtpu: 0.0.40
codegen_flags: <defaults>
</compile_context>

<pallas_src>
import functools

import jax
import jax.numpy as jnp
from jax.experimental import pallas as pl
from jax.experimental.pallas import tpu as pltpu

N_HEADS = 8


def _split_heads(x, n_heads, dh):
    """(L, n_heads*dh) -> (n_heads, L, dh) via static lane slices + major concat."""
    return jnp.concatenate(
        [x[None, :, h * dh:(h + 1) * dh] for h in range(n_heads)], axis=0)


def _merge_heads(x, n_heads):
    """(n_heads, L, dh) -> (L, n_heads*dh)."""
    return jnp.concatenate([x[h] for h in range(n_heads)], axis=-1)


def _cross_attn_kernel(q_ref, kv_ref, wq_ref, wk_ref, wv_ref, wo_ref, bo_ref,
                       o_ref, kh_sc, vh_sc, *, n_heads, dh, compute_dtype,
                       approx_recip):
    """One grid step == one (batch, Lq-tile). K/V projections are computed and
    head-split once per batch (first Lq tile) into persistent VMEM scratch."""
    mm_dtype = kh_sc.dtype  # bf16 when compute_dtype is set, else f32

    # ---- K/V projection + head split: once per batch. --------------------
    @pl.when(pl.program_id(1) == 0)
    def _():
        kvb = kv_ref[0]                                   # (Lkv, dim_kv)
        if compute_dtype is not None:
            kvb = kvb.astype(compute_dtype)
        kp = jnp.dot(kvb, wk_ref[...], preferred_element_type=jnp.float32)
        vp = jnp.dot(kvb, wv_ref[...], preferred_element_type=jnp.float32)
        kh_sc[...] = _split_heads(kp, n_heads, dh).astype(mm_dtype)
        vh_sc[...] = _split_heads(vp, n_heads, dh).astype(mm_dtype)

    # ---- Q projection (1/sqrt(dh) pre-folded into Wq on the host). -------
    qb = q_ref[0]                                         # (TQ, dim_q)
    if compute_dtype is not None:
        qb = qb.astype(compute_dtype)
    qp = jnp.dot(qb, wq_ref[...], preferred_element_type=jnp.float32)
    qh = _split_heads(qp, n_heads, dh).astype(mm_dtype)   # (H, TQ, dh)

    # ---- Batched attention scores + softmax (f32 VPU math). --------------
    s = jnp.einsum("hqd,hkd->hqk", qh, kh_sc[...],
                   preferred_element_type=jnp.float32)    # (H, TQ, Lkv)
    s_max = jnp.max(s, axis=-1, keepdims=True)
    p = jnp.exp(s - s_max)
    l = jnp.sum(p, axis=-1, keepdims=True)                # (H, TQ, 1)

    # ---- Un-normalized P @ V, then deferred normalization on (H, TQ, dh). -
    o_h = jnp.einsum("hqk,hkd->hqd", p.astype(mm_dtype), vh_sc[...],
                     preferred_element_type=jnp.float32)  # (H, TQ, dh)
    o_h = o_h * pl.reciprocal(l, approx=approx_recip)

    # ---- Merge heads, single full-width output projection + bias. --------
    o_cat = _merge_heads(o_h, n_heads)                    # (TQ, dim_q)
    o_cat = o_cat.astype(mm_dtype)
    out = jnp.dot(o_cat, wo_ref[...], preferred_element_type=jnp.float32)
    out = out + bo_ref[...].astype(jnp.float32)
    o_ref[0] = out.astype(o_ref.dtype)


def cross_attention(q, kv, wq, wk, wv, wo, bo, *, compute_dtype=None,
                    q_tile=None, approx_recip=False,
                    vmem_limit_bytes=48 * 1024 * 1024):
    """q: (B, Lq, dim_q), kv: (B, Lkv, dim_kv). Weights stored (in, out).

    compute_dtype: optional dtype (e.g. jnp.bfloat16) for ALL MXU matmul
      operands (weights pre-cast on the host, activations cast in-kernel);
      accumulation and softmax stay in f32. None keeps the input dtype
      end-to-end (exact match vs. the f32 reference).
    q_tile: Lq tile size (defaults to 256, falls back to full Lq if it does
      not divide Lq).
    """
    B, Lq, dim_q = q.shape
    Bk, Lkv, dim_kv = kv.shape
    assert Bk == B
    assert dim_q % N_HEADS == 0
    dh = dim_q // N_HEADS

    # Fold 1/sqrt(dh) into Wq on the host (removes TQ*dim_q VPU mults/step).
    scale = dh ** (-0.5)
    wq_scaled = wq.astype(jnp.float32) * scale

    # Pre-cast weights to the MXU compute dtype (halves weight DMA + VMEM in bf16).
    if compute_dtype is not None:
        wq_p = wq_scaled.astype(compute_dtype)
        wk_p = wk.astype(compute_dtype)
        wv_p = wv.astype(compute_dtype)
        wo_p = wo.astype(compute_dtype)
    else:
        wq_p = wq_scaled.astype(wq.dtype)
        wk_p, wv_p, wo_p = wk, wv, wo
    bo2d = bo.reshape(1, dim_q).astype(jnp.float32)   # bias added in f32

    # Lq tiling: bounded per-step working set + enough steps to pipeline.
    if q_tile is None:
        q_tile = 256
    if Lq < q_tile or Lq % q_tile != 0:
        q_tile = Lq
    num_q_tiles = Lq // q_tile

    scratch_dtype = compute_dtype if compute_dtype is not None else jnp.float32

    kernel = functools.partial(
        _cross_attn_kernel, n_heads=N_HEADS, dh=dh,
        compute_dtype=compute_dtype, approx_recip=approx_recip)

    vmem = pltpu.MemorySpace.VMEM

    return pl.pallas_call(
        kernel,
        out_shape=jax.ShapeDtypeStruct((B, Lq, dim_q), q.dtype),
        grid_spec=pltpu.PrefetchScalarGridSpec(
            num_scalar_prefetch=0,
            grid=(B, num_q_tiles),
            in_specs=[
                pl.BlockSpec((1, q_tile, dim_q), lambda b, i: (b, i, 0)),  # q
                pl.BlockSpec((1, Lkv, dim_kv), lambda b, i: (b, 0, 0)),    # kv
                # Grid-invariant params: whole array resident in VMEM once
                # (no per-step pipeline double-buffering).
                pl.BlockSpec(memory_space=vmem),                           # Wq
                pl.BlockSpec(memory_space=vmem),                           # Wk
                pl.BlockSpec(memory_space=vmem),                           # Wv
                pl.BlockSpec(memory_space=vmem),                           # Wo
                pl.BlockSpec(memory_space=vmem),                           # bias
            ],
            out_specs=pl.BlockSpec((1, q_tile, dim_q), lambda b, i: (b, i, 0)),
            scratch_shapes=[
                pltpu.VMEM((N_HEADS, Lkv, dh), scratch_dtype),   # K heads
                pltpu.VMEM((N_HEADS, Lkv, dh), scratch_dtype),   # V heads
            ],
        ),
        compiler_params=pltpu.CompilerParams(
            dimension_semantics=("parallel", "arbitrary"),
            vmem_limit_bytes=vmem_limit_bytes,
        ),
    )(q, kv, wq_p, wk_p, wv_p, wo_p, bo2d)


def _reference(q, kv, wq, wk, wv, wo, bo):
    """Pure-JAX reference mirroring the PyTorch forward exactly."""
    B, Lq, dim_q = q.shape
    dh = dim_q // N_HEADS
    qp = q @ wq
    kp = kv @ wk
    vp = kv @ wv

    def split(x):
        b, L, d = x.shape
        return x.reshape(b, L, N_HEADS, d // N_HEADS).transpose(0, 2, 1, 3)

    qh, kh, vh = split(qp), split(kp), split(vp)            # (B, 8, L, dh)
    s = jnp.einsum("bhqd,bhkd->bhqk", qh, kh) * (dh ** -0.5)
    p = jax.nn.softmax(s, axis=-1)
    o = jnp.einsum("bhqk,bhkd->bhqd", p, vh)                 # (B, 8, Lq, dh)
    o = o.transpose(0, 2, 1, 3).reshape(B, Lq, dim_q)
    return o @ wo + bo


if __name__ == "__main__":
    B, Lq, Lkv = 2, 16, 8
    dim_q, dim_kv = 64, 48

    key = jax.random.PRNGKey(0)
    ks = jax.random.split(key, 7)
    q = jax.random.normal(ks[0], (B, Lq, dim_q), dtype=jnp.float32)
    kv = jax.random.normal(ks[1], (B, Lkv, dim_kv), dtype=jnp.float32)
    # Deterministic synthetic parameters (nn.Linear shapes, stored (in, out)).
    wq = jax.random.normal(ks[2], (dim_q, dim_q), dtype=jnp.float32) * 0.1
    wk = jax.random.normal(ks[3], (dim_kv, dim_q), dtype=jnp.float32) * 0.1
    wv = jax.random.normal(ks[4], (dim_kv, dim_q), dtype=jnp.float32) * 0.1
    wo = jax.random.normal(ks[5], (dim_q, dim_q), dtype=jnp.float32) * 0.1
    bo = jax.random.normal(ks[6], (dim_q,), dtype=jnp.float32) * 0.1

    ref = _reference(q, kv, wq, wk, wv, wo, bo)

    # f32 path: must match the f32 reference closely.
    out = jax.block_until_ready(cross_attention(q, kv, wq, wk, wv, wo, bo))
    assert out.shape == (B, Lq, dim_q)
    assert jnp.allclose(out, ref, atol=1e-3, rtol=1e-3), "f32 mismatch vs reference"

    # bf16 MXU path (production setting): operands bf16, accumulation/softmax f32.
    out_bf16 = jax.block_until_ready(
        cross_attention(q, kv, wq, wk, wv, wo, bo, compute_dtype=jnp.bfloat16))
    assert out_bf16.shape == (B, Lq, dim_q)
    assert jnp.allclose(out_bf16.astype(jnp.float32), ref, atol=1e-1, rtol=1e-1), \
        "bf16 drift too large vs reference"

    print("KERNEL_OK")
</pallas_src>

<mosaic_0001>
module attributes {stable_mosaic.version = 11 : i64} {
  func.func @_cross_attn_kernel(%arg0: i32, %arg1: i32, %arg2: memref<1x16x64xf32, #tpu.memory_space<vmem>>, %arg3: memref<1x8x48xf32, #tpu.memory_space<vmem>>, %arg4: memref<64x64xf32, #tpu.memory_space<vmem>>, %arg5: memref<48x64xf32, #tpu.memory_space<vmem>>, %arg6: memref<48x64xf32, #tpu.memory_space<vmem>>, %arg7: memref<64x64xf32, #tpu.memory_space<vmem>>, %arg8: memref<1x64xf32, #tpu.memory_space<vmem>>, %arg9: memref<1x16x64xf32, #tpu.memory_space<vmem>>, %arg10: memref<8x8x8xf32, #tpu.memory_space<vmem>>, %arg11: memref<8x8x8xf32, #tpu.memory_space<vmem>>) attributes {dimension_semantics = [#tpu.dimension_semantics<parallel>, #tpu.dimension_semantics<arbitrary>], iteration_bounds = array<i64: 2, 1>, scalar_prefetch = 0 : i64, scratch_operands = 2 : i64, tpu.core_type = #tpu.core_type<tc>, window_params = [{transform_indices = @transform_0, window_bounds = array<i64: 1, 16, 64>}, {transform_indices = @transform_1, window_bounds = array<i64: 1, 8, 48>}, {pipeline_mode = #tpu.pipeline_mode<synchronous>, transform_indices = @transform_2, window_bounds = array<i64: 64, 64>}, {pipeline_mode = #tpu.pipeline_mode<synchronous>, transform_indices = @transform_3, window_bounds = array<i64: 48, 64>}, {pipeline_mode = #tpu.pipeline_mode<synchronous>, transform_indices = @transform_4, window_bounds = array<i64: 48, 64>}, {pipeline_mode = #tpu.pipeline_mode<synchronous>, transform_indices = @transform_5, window_bounds = array<i64: 64, 64>}, {pipeline_mode = #tpu.pipeline_mode<synchronous>, transform_indices = @transform_6, window_bounds = array<i64: 1, 64>}, {transform_indices = @transform_7, window_bounds = array<i64: 1, 16, 64>}]} {
    %c0_i32 = arith.constant 0 : i32
    %0 = arith.cmpi eq, %arg1, %c0_i32 : i32
    %1 = arith.extui %0 : i1 to i32
    %c0_i32_0 = arith.constant 0 : i32
    %2 = arith.cmpi ne, %1, %c0_i32_0 : i32
    scf.if %2 {
      %c0_23 = arith.constant 0 : index
      %c0_24 = arith.constant 0 : index
      %c0_25 = arith.constant 0 : index
      %63 = vector.load %arg3[%c0_23, %c0_24, %c0_25] : memref<1x8x48xf32, #tpu.memory_space<vmem>>, vector<1x8x48xf32>
      %64 = vector.shape_cast %63 : vector<1x8x48xf32> to vector<8x48xf32>
      %c0_26 = arith.constant 0 : index
      %c0_27 = arith.constant 0 : index
      %65 = vector.load %arg5[%c0_26, %c0_27] : memref<48x64xf32, #tpu.memory_space<vmem>>, vector<48x64xf32>
      %cst_28 = arith.constant dense<0.000000e+00> : vector<8x64xf32>
      %66 = tpu.matmul %64, %65, %cst_28 {dimension_numbers = #tpu.dot_dimension_numbers<[1], [0], [0], [1], [0, 0, 1, 1], [], []>} : vector<8x48xf32>, vector<48x64xf32>, vector<8x64xf32> -> vector<8x64xf32>
      %c0_29 = arith.constant 0 : index
      %c0_30 = arith.constant 0 : index
      %67 = vector.load %arg6[%c0_29, %c0_30] : memref<48x64xf32, #tpu.memory_space<vmem>>, vector<48x64xf32>
      %cst_31 = arith.constant dense<0.000000e+00> : vector<8x64xf32>
      %68 = tpu.matmul %64, %67, %cst_31 {dimension_numbers = #tpu.dot_dimension_numbers<[1], [0], [0], [1], [0, 0, 1, 1], [], []>} : vector<8x48xf32>, vector<48x64xf32>, vector<8x64xf32> -> vector<8x64xf32>
      %69 = vector.extract_strided_slice %66 {offsets = [0, 0], sizes = [8, 8], strides = [1, 1]} : vector<8x64xf32> to vector<8x8xf32>
      %70 = vector.shape_cast %69 : vector<8x8xf32> to vector<1x8x8xf32>
      %71 = vector.extract_strided_slice %66 {offsets = [0, 8], sizes = [8, 8], strides = [1, 1]} : vector<8x64xf32> to vector<8x8xf32>
      %72 = vector.shape_cast %71 : vector<8x8xf32> to vector<1x8x8xf32>
      %73 = vector.extract_strided_slice %66 {offsets = [0, 16], sizes = [8, 8], strides = [1, 1]} : vector<8x64xf32> to vector<8x8xf32>
      %74 = vector.shape_cast %73 : vector<8x8xf32> to vector<1x8x8xf32>
      %75 = vector.extract_strided_slice %66 {offsets = [0, 24], sizes = [8, 8], strides = [1, 1]} : vector<8x64xf32> to vector<8x8xf32>
      %76 = vector.shape_cast %75 : vector<8x8xf32> to vector<1x8x8xf32>
      %77 = vector.extract_strided_slice %66 {offsets = [0, 32], sizes = [8, 8], strides = [1, 1]} : vector<8x64xf32> to vector<8x8xf32>
      %78 = vector.shape_cast %77 : vector<8x8xf32> to vector<1x8x8xf32>
      %79 = vector.extract_strided_slice %66 {offsets = [0, 40], sizes = [8, 8], strides = [1, 1]} : vector<8x64xf32> to vector<8x8xf32>
      %80 = vector.shape_cast %79 : vector<8x8xf32> to vector<1x8x8xf32>
      %81 = vector.extract_strided_slice %66 {offsets = [0, 48], sizes = [8, 8], strides = [1, 1]} : vector<8x64xf32> to vector<8x8xf32>
      %82 = vector.shape_cast %81 : vector<8x8xf32> to vector<1x8x8xf32>
      %83 = vector.extract_strided_slice %66 {offsets = [0, 56], sizes = [8, 8], strides = [1, 1]} : vector<8x64xf32> to vector<8x8xf32>
      %84 = vector.shape_cast %83 : vector<8x8xf32> to vector<1x8x8xf32>
      %85 = tpu.concatenate %70, %72, %74, %76, %78, %80, %82, %84 in 0 : vector<1x8x8xf32>, vector<1x8x8xf32>, vector<1x8x8xf32>, vector<1x8x8xf32>, vector<1x8x8xf32>, vector<1x8x8xf32>, vector<1x8x8xf32>, vector<1x8x8xf32> -> vector<8x8x8xf32>
      %c0_32 = arith.constant 0 : index
      %c0_33 = arith.constant 0 : index
      %c0_34 = arith.constant 0 : index
      %86 = vector.load %arg10[%c0_32, %c0_33, %c0_34] : memref<8x8x8xf32, #tpu.memory_space<vmem>>, vector<8x8x8xf32>
      tpu.vector_store %arg10[%c0_32, %c0_33, %c0_34], %85 {strides = array<i32>} : memref<8x8x8xf32, #tpu.memory_space<vmem>>, vector<8x8x8xf32>,
      %87 = vector.extract_strided_slice %68 {offsets = [0, 0], sizes = [8, 8], strides = [1, 1]} : vector<8x64xf32> to vector<8x8xf32>
      %88 = vector.shape_cast %87 : vector<8x8xf32> to vector<1x8x8xf32>
      %89 = vector.extract_strided_slice %68 {offsets = [0, 8], sizes = [8, 8], strides = [1, 1]} : vector<8x64xf32> to vector<8x8xf32>
      %90 = vector.shape_cast %89 : vector<8x8xf32> to vector<1x8x8xf32>
      %91 = vector.extract_strided_slice %68 {offsets = [0, 16], sizes = [8, 8], strides = [1, 1]} : vector<8x64xf32> to vector<8x8xf32>
      %92 = vector.shape_cast %91 : vector<8x8xf32> to vector<1x8x8xf32>
      %93 = vector.extract_strided_slice %68 {offsets = [0, 24], sizes = [8, 8], strides = [1, 1]} : vector<8x64xf32> to vector<8x8xf32>
      %94 = vector.shape_cast %93 : vector<8x8xf32> to vector<1x8x8xf32>
      %95 = vector.extract_strided_slice %68 {offsets = [0, 32], sizes = [8, 8], strides = [1, 1]} : vector<8x64xf32> to vector<8x8xf32>
      %96 = vector.shape_cast %95 : vector<8x8xf32> to vector<1x8x8xf32>
      %97 = vector.extract_strided_slice %68 {offsets = [0, 40], sizes = [8, 8], strides = [1, 1]} : vector<8x64xf32> to vector<8x8xf32>
      %98 = vector.shape_cast %97 : vector<8x8xf32> to vector<1x8x8xf32>
      %99 = vector.extract_strided_slice %68 {offsets = [0, 48], sizes = [8, 8], strides = [1, 1]} : vector<8x64xf32> to vector<8x8xf32>
      %100 = vector.shape_cast %99 : vector<8x8xf32> to vector<1x8x8xf32>
      %101 = vector.extract_strided_slice %68 {offsets = [0, 56], sizes = [8, 8], strides = [1, 1]} : vector<8x64xf32> to vector<8x8xf32>
      %102 = vector.shape_cast %101 : vector<8x8xf32> to vector<1x8x8xf32>
      %103 = tpu.concatenate %88, %90, %92, %94, %96, %98, %100, %102 in 0 : vector<1x8x8xf32>, vector<1x8x8xf32>, vector<1x8x8xf32>, vector<1x8x8xf32>, vector<1x8x8xf32>, vector<1x8x8xf32>, vector<1x8x8xf32>, vector<1x8x8xf32> -> vector<8x8x8xf32>
      %c0_35 = arith.constant 0 : index
      %c0_36 = arith.constant 0 : index
      %c0_37 = arith.constant 0 : index
      %104 = vector.load %arg11[%c0_35, %c0_36, %c0_37] : memref<8x8x8xf32, #tpu.memory_space<vmem>>, vector<8x8x8xf32>
      tpu.vector_store %arg11[%c0_35, %c0_36, %c0_37], %103 {strides = array<i32>} : memref<8x8x8xf32, #tpu.memory_space<vmem>>, vector<8x8x8xf32>,
    } else {
    }
    %c0 = arith.constant 0 : index
    %c0_1 = arith.constant 0 : index
    %c0_2 = arith.constant 0 : index
    %3 = vector.load %arg2[%c0, %c0_1, %c0_2] : memref<1x16x64xf32, #tpu.memory_space<vmem>>, vector<1x16x64xf32>
    %4 = vector.shape_cast %3 : vector<1x16x64xf32> to vector<16x64xf32>
    %c0_3 = arith.constant 0 : index
    %c0_4 = arith.constant 0 : index
    %5 = vector.load %arg4[%c0_3, %c0_4] : memref<64x64xf32, #tpu.memory_space<vmem>>, vector<64x64xf32>
    %cst = arith.constant dense<0.000000e+00> : vector<16x64xf32>
    %6 = tpu.matmul %4, %5, %cst {dimension_numbers = #tpu.dot_dimension_numbers<[1], [0], [0], [1], [0, 0, 1, 1], [], []>} : vector<16x64xf32>, vector<64x64xf32>, vector<16x64xf32> -> vector<16x64xf32>
    %7 = vector.extract_strided_slice %6 {offsets = [0, 0], sizes = [16, 8], strides = [1, 1]} : vector<16x64xf32> to vector<16x8xf32>
    %8 = vector.shape_cast %7 : vector<16x8xf32> to vector<1x16x8xf32>
    %9 = vector.extract_strided_slice %6 {offsets = [0, 8], sizes = [16, 8], strides = [1, 1]} : vector<16x64xf32> to vector<16x8xf32>
    %10 = vector.shape_cast %9 : vector<16x8xf32> to vector<1x16x8xf32>
    %11 = vector.extract_strided_slice %6 {offsets = [0, 16], sizes = [16, 8], strides = [1, 1]} : vector<16x64xf32> to vector<16x8xf32>
    %12 = vector.shape_cast %11 : vector<16x8xf32> to vector<1x16x8xf32>
    %13 = vector.extract_strided_slice %6 {offsets = [0, 24], sizes = [16, 8], strides = [1, 1]} : vector<16x64xf32> to vector<16x8xf32>
    %14 = vector.shape_cast %13 : vector<16x8xf32> to vector<1x16x8xf32>
    %15 = vector.extract_strided_slice %6 {offsets = [0, 32], sizes = [16, 8], strides = [1, 1]} : vector<16x64xf32> to vector<16x8xf32>
    %16 = vector.shape_cast %15 : vector<16x8xf32> to vector<1x16x8xf32>
    %17 = vector.extract_strided_slice %6 {offsets = [0, 40], sizes = [16, 8], strides = [1, 1]} : vector<16x64xf32> to vector<16x8xf32>
    %18 = vector.shape_cast %17 : vector<16x8xf32> to vector<1x16x8xf32>
    %19 = vector.extract_strided_slice %6 {offsets = [0, 48], sizes = [16, 8], strides = [1, 1]} : vector<16x64xf32> to vector<16x8xf32>
    %20 = vector.shape_cast %19 : vector<16x8xf32> to vector<1x16x8xf32>
    %21 = vector.extract_strided_slice %6 {offsets = [0, 56], sizes = [16, 8], strides = [1, 1]} : vector<16x64xf32> to vector<16x8xf32>
    %22 = vector.shape_cast %21 : vector<16x8xf32> to vector<1x16x8xf32>
    %23 = tpu.concatenate %8, %10, %12, %14, %16, %18, %20, %22 in 0 : vector<1x16x8xf32>, vector<1x16x8xf32>, vector<1x16x8xf32>, vector<1x16x8xf32>, vector<1x16x8xf32>, vector<1x16x8xf32>, vector<1x16x8xf32>, vector<1x16x8xf32> -> vector<8x16x8xf32>
    %c0_5 = arith.constant 0 : index
    %c0_6 = arith.constant 0 : index
    %c0_7 = arith.constant 0 : index
    %24 = vector.load %arg10[%c0_5, %c0_6, %c0_7] : memref<8x8x8xf32, #tpu.memory_space<vmem>>, vector<8x8x8xf32>
    "tpu.trace_start"() <{level = 10 : i32, message = "hqd,hkd->hqk"}> : () -> ()
    %cst_8 = arith.constant dense<0.000000e+00> : vector<8x16x8xf32>
    %25 = tpu.matmul %23, %24, %cst_8 {dimension_numbers = #tpu.dot_dimension_numbers<[2], [2], [1], [1], [0, 0, 0, 1, 1, 1], [0], [0]>} : vector<8x16x8xf32>, vector<8x8x8xf32>, vector<8x16x8xf32> -> vector<8x16x8xf32>
    "tpu.trace_stop"() : () -> ()
    %cst_9 = arith.constant dense<0xFF800000> : vector<8x16xf32>
    %26 = vector.multi_reduction <maximumf>, %25, %cst_9 [2] : vector<8x16x8xf32> to vector<8x16xf32>
    %27 = vector.shape_cast %26 : vector<8x16xf32> to vector<8x16x1xf32>
    %28 = vector.broadcast %27 : vector<8x16x1xf32> to vector<8x16x8xf32>
    %29 = arith.subf %25, %28 : vector<8x16x8xf32>
    %30 = math.exp %29 : vector<8x16x8xf32>
    %cst_10 = arith.constant dense<0.000000e+00> : vector<8x16xf32>
    %31 = vector.multi_reduction <add>, %30, %cst_10 [2] : vector<8x16x8xf32> to vector<8x16xf32>
    %32 = vector.shape_cast %31 : vector<8x16xf32> to vector<8x16x1xf32>
    %c0_11 = arith.constant 0 : index
    %c0_12 = arith.constant 0 : index
    %c0_13 = arith.constant 0 : index
    %33 = vector.load %arg11[%c0_11, %c0_12, %c0_13] : memref<8x8x8xf32, #tpu.memory_space<vmem>>, vector<8x8x8xf32>
    "tpu.trace_start"() <{level = 10 : i32, message = "hqk,hkd->hqd"}> : () -> ()
    %cst_14 = arith.constant dense<0.000000e+00> : vector<8x16x8xf32>
    %34 = tpu.matmul %30, %33, %cst_14 {dimension_numbers = #tpu.dot_dimension_numbers<[2], [1], [1], [2], [0, 0, 0, 1, 1, 2], [0], [0]>} : vector<8x16x8xf32>, vector<8x8x8xf32>, vector<8x16x8xf32> -> vector<8x16x8xf32>
    "tpu.trace_stop"() : () -> ()
    %35 = tpu.reciprocal %32 : vector<8x16x1xf32> -> vector<8x16x1xf32>
    %36 = vector.broadcast %35 : vector<8x16x1xf32> to vector<8x16x8xf32>
    %37 = arith.mulf %34, %36 : vector<8x16x8xf32>
    %38 = vector.extract_strided_slice %37 {offsets = [0, 0, 0], sizes = [1, 16, 8], strides = [1, 1, 1]} : vector<8x16x8xf32> to vector<1x16x8xf32>
    %39 = vector.shape_cast %38 : vector<1x16x8xf32> to vector<16x8xf32>
    %40 = vector.extract_strided_slice %37 {offsets = [1, 0, 0], sizes = [1, 16, 8], strides = [1, 1, 1]} : vector<8x16x8xf32> to vector<1x16x8xf32>
    %41 = vector.shape_cast %40 : vector<1x16x8xf32> to vector<16x8xf32>
    %42 = vector.extract_strided_slice %37 {offsets = [2, 0, 0], sizes = [1, 16, 8], strides = [1, 1, 1]} : vector<8x16x8xf32> to vector<1x16x8xf32>
    %43 = vector.shape_cast %42 : vector<1x16x8xf32> to vector<16x8xf32>
    %44 = vector.extract_strided_slice %37 {offsets = [3, 0, 0], sizes = [1, 16, 8], strides = [1, 1, 1]} : vector<8x16x8xf32> to vector<1x16x8xf32>
    %45 = vector.shape_cast %44 : vector<1x16x8xf32> to vector<16x8xf32>
    %46 = vector.extract_strided_slice %37 {offsets = [4, 0, 0], sizes = [1, 16, 8], strides = [1, 1, 1]} : vector<8x16x8xf32> to vector<1x16x8xf32>
    %47 = vector.shape_cast %46 : vector<1x16x8xf32> to vector<16x8xf32>
    %48 = vector.extract_strided_slice %37 {offsets = [5, 0, 0], sizes = [1, 16, 8], strides = [1, 1, 1]} : vector<8x16x8xf32> to vector<1x16x8xf32>
    %49 = vector.shape_cast %48 : vector<1x16x8xf32> to vector<16x8xf32>
    %50 = vector.extract_strided_slice %37 {offsets = [6, 0, 0], sizes = [1, 16, 8], strides = [1, 1, 1]} : vector<8x16x8xf32> to vector<1x16x8xf32>
    %51 = vector.shape_cast %50 : vector<1x16x8xf32> to vector<16x8xf32>
    %52 = vector.extract_strided_slice %37 {offsets = [7, 0, 0], sizes = [1, 16, 8], strides = [1, 1, 1]} : vector<8x16x8xf32> to vector<1x16x8xf32>
    %53 = vector.shape_cast %52 : vector<1x16x8xf32> to vector<16x8xf32>
    %54 = tpu.concatenate %39, %41, %43, %45, %47, %49, %51, %53 in 1 : vector<16x8xf32>, vector<16x8xf32>, vector<16x8xf32>, vector<16x8xf32>, vector<16x8xf32>, vector<16x8xf32>, vector<16x8xf32>, vector<16x8xf32> -> vector<16x64xf32>
    %c0_15 = arith.constant 0 : index
    %c0_16 = arith.constant 0 : index
    %55 = vector.load %arg7[%c0_15, %c0_16] : memref<64x64xf32, #tpu.memory_space<vmem>>, vector<64x64xf32>
    %cst_17 = arith.constant dense<0.000000e+00> : vector<16x64xf32>
    %56 = tpu.matmul %54, %55, %cst_17 {dimension_numbers = #tpu.dot_dimension_numbers<[1], [0], [0], [1], [0, 0, 1, 1], [], []>} : vector<16x64xf32>, vector<64x64xf32>, vector<16x64xf32> -> vector<16x64xf32>
    %c0_18 = arith.constant 0 : index
    %c0_19 = arith.constant 0 : index
    %57 = vector.load %arg8[%c0_18, %c0_19] : memref<1x64xf32, #tpu.memory_space<vmem>>, vector<1x64xf32>
    %58 = vector.broadcast %57 : vector<1x64xf32> to vector<16x64xf32>
    %59 = arith.addf %56, %58 : vector<16x64xf32>
    %c0_20 = arith.constant 0 : index
    %c0_21 = arith.constant 0 : index
    %c0_22 = arith.constant 0 : index
    %60 = vector.load %arg9[%c0_20, %c0_21, %c0_22] : memref<1x16x64xf32, #tpu.memory_space<vmem>>, vector<1x16x64xf32>
    %61 = vector.shape_cast %60 : vector<1x16x64xf32> to vector<16x64xf32>
    %62 = vector.shape_cast %59 : vector<16x64xf32> to vector<1x16x64xf32>
    tpu.vector_store %arg9[%c0_20, %c0_21, %c0_22], %62 {strides = array<i32>} : memref<1x16x64xf32, #tpu.memory_space<vmem>>, vector<1x16x64xf32>,
    return
  }
  func.func @transform_0(%arg0: i32, %arg1: i32) -> (i32, i32, i32) {
    %c0_i32 = arith.constant 0 : i32
    %c0_i32_0 = arith.constant 0 : i32
    return %arg0, %arg1, %c0_i32 : i32, i32, i32
  }
  func.func @transform_1(%arg0: i32, %arg1: i32) -> (i32, i32, i32) {
    %c0_i32 = arith.constant 0 : i32
    %c0_i32_0 = arith.constant 0 : i32
    %c0_i32_1 = arith.constant 0 : i32
    return %arg0, %c0_i32, %c0_i32_0 : i32, i32, i32
  }
  func.func @transform_2(%arg0: i32, %arg1: i32) -> (i32, i32) {
    %c0_i32 = arith.constant 0 : i32
    %c0_i32_0 = arith.constant 0 : i32
    %c0_i32_1 = arith.constant 0 : i32
    return %c0_i32, %c0_i32_0 : i32, i32
  }
  func.func @transform_3(%arg0: i32, %arg1: i32) -> (i32, i32) {
    %c0_i32 = arith.constant 0 : i32
    %c0_i32_0 = arith.constant 0 : i32
    %c0_i32_1 = arith.constant 0 : i32
    return %c0_i32, %c0_i32_0 : i32, i32
  }
  func.func @transform_4(%arg0: i32, %arg1: i32) -> (i32, i32) {
    %c0_i32 = arith.constant 0 : i32
    %c0_i32_0 = arith.constant 0 : i32
    %c0_i32_1 = arith.constant 0 : i32
    return %c0_i32, %c0_i32_0 : i32, i32
  }
  func.func @transform_5(%arg0: i32, %arg1: i32) -> (i32, i32) {
    %c0_i32 = arith.constant 0 : i32
    %c0_i32_0 = arith.constant 0 : i32
    %c0_i32_1 = arith.constant 0 : i32
    return %c0_i32, %c0_i32_0 : i32, i32
  }
  func.func @transform_6(%arg0: i32, %arg1: i32) -> (i32, i32) {
    %c0_i32 = arith.constant 0 : i32
    %c0_i32_0 = arith.constant 0 : i32
    %c0_i32_1 = arith.constant 0 : i32
    return %c0_i32, %c0_i32_0 : i32, i32
  }
  func.func @transform_7(%arg0: i32, %arg1: i32) -> (i32, i32, i32) {
    %c0_i32 = arith.constant 0 : i32
    %c0_i32_0 = arith.constant 0 : i32
    return %arg0, %arg1, %c0_i32 : i32, i32, i32
  }
}

</mosaic_0001>

<bundles_post_ra>
// kernel: tpu_custom_call.1
= control target key start
LH: loop header
LB: loop body
LE: loop exit
PB: predicated region body
PF: predicated region fallthrough
CT: control target
= control target key end

     0   :  { %s4067_s0 = inlined_call_operand.hbm [shape: f32[2,16,64], index: 0, kind: input, shape index: {}]   ;;  %s4068_s1 = inlined_call_operand.hbm [shape: f32[2,8,48], index: 1, kind: input, shape index: {}]   ;;  %s4069_s2 = inlined_call_operand.hbm [shape: f32[64,64], index: 2, kind: input, shape index: {}]   ;;  %s4070_s3 = inlined_call_operand.hbm [shape: f32[48,64], index: 3, kind: input, shape index: {}]   ;;  %s4071_s4 = inlined_call_operand.hbm [shape: f32[48,64], index: 4, kind: input, shape index: {}]   ;;  %s4072_s5 = inlined_call_operand.hbm [shape: f32[64,64], index: 5, kind: input, shape index: {}]   ;;  %s4073_s6 = inlined_call_operand.vmem [shape: f32[1,64], index: 6, kind: input, shape index: {}]   ;;  %s4074_s7 = inlined_call_operand.hbm [shape: f32[2,16,64], index: 7, kind: output, shape index: {}]  }
   0x1   :  { %4083 = sst [smem:[#allocation24_spill]] %s4067_s0 }
   0x2   :  { %4084 = sst [smem:[#allocation25_spill]] %s4069_s2 }
   0x3   :  { %4085 = sst [smem:[#allocation26_spill]] %s4070_s3 }
   0x4   :  { %4086 = sst [smem:[#allocation27_spill]] %s4071_s4 }
   0x5   :  { %4087 = sst [smem:[#allocation28_spill]] %s4074_s7 }
   0x6   :  { %12 = vsyncpa [#allocation5], 0 }
   0x7   :  { %14 = vsyncpa [#allocation5 + $0x1], 0 }
   0x8   :  { %15 = vsyncpa [#allocation8], 0 }
   0x9   :  { %17 = vsyncpa [#allocation8 + $0x1], 0 }
   0xa   :  { %18 = vsyncpa [#allocation11], 0 }
   0xb   :  { %19 = vsyncpa [#allocation14], 0 }
   0xc   :  { %20 = vsyncpa [#allocation6], 0 }
   0xd   :  { %22 = vsyncpa [#allocation6 + $0x1], 0  ;;  %s3477_s24 = smov 0   ;;  %s3479_s25 = smov 0  }
   0xe   :  { %s3481_s26 = smov 0   ;;  %s3483_s27 = smov 0  }
   0xf   :  { %s3485_s28 = smov 0   ;;  %s3487_s29 = smov 0  }
  0x10 LB: > { %4088 = sst [smem:[#allocation22_spill]] %s3388_s24  ;;  %s3508_s30 = sadd.s32 4294967295, %s3408_s29   ;;  %s3408_s29 = sphi %s3487_s29, %s28_s29   ;;  %s3404_s28 = sphi %s3485_s28, %s4122_s28   ;;  %s3400_s27 = sphi %s3483_s27, %s4121_s27   ;;  %s3396_s26 = sphi %s3481_s26, %s4120_s26   ;;  %s3392_s25 = sphi %s3479_s25, %s4119_s25   ;;  %s3388_s24 = sphi %s3477_s24, %s4118_s24  }
  0x11   : > { %s2592_s8 = sadd.s32 4294967294, %s3408_s29   ;;  %p62_p0 = scmp.ne.s32.totalorder %s3392_s25, %s3388_s24 }
  0x12   : > { %p4075_p1 = scmp.eq.s32.totalorder %s3508_s30, 0  ;;  %p225_p3 = scmp.eq.s32.totalorder %s2592_s8, 1 }
  0x13   : > { %p2593_p5 = scmp.ge.s32.totalorder %s3408_s29, 1  ;;  %p232_p7 = scmp.lt.s32.totalorder %s3408_s29, 3 }
  0x14   : > { %p3517_p4 = por %p4075_p1, %p62_p0  ;;  %p3522_p6 = por %p225_p3, %p62_p0 }
  0x15   : > { %p3527_p8 = pnand %p2593_p5, %p232_p7  ;;  %s3410_s12 = smov [#allocation9]  }
  0x16   : > { %s4089_s9 = scalar_select %p3517_p4, 1, 0 }
  0x17   : > { %s4090_s10 = scalar_select %p3522_p6, 1, 0 }
  0x18   : > { %s4092_s11 = scalar_select %p3527_p8, 1, 0 }
  0x19   : > { %4091 = sst [smem:[#allocation23_spill]] %s4090_s10  ;;  %s244_s13 = sshll.u32 %s3410_s12, 4  ;;  %s3531_s13 = int_to_ptr.vmem [resolvable:$true] %s244_s13 }
  0x1a   : > { %p2968_p9 = pneg %p3527_p8  ;;  %s3411_s15 = smov [#allocation10]  }
  0x1b   : > { %s257_s16 = sshll.u32 %s3411_s15, 4  ;;  %s3412_s17 = smov [#allocation12]   ;;  %s3542_s16 = int_to_ptr.vmem [resolvable:$true] %s257_s16 }
  0x1c   : > { %p3538_p11 = pnand %p2968_p9, %p4075_p1  ;;  %s3544_s18 = sshll.u32 %s3412_s17, 4  ;;  %s271_s18 = int_to_ptr.vmem [resolvable:$true] %s3544_s18 }
  0x1d   : > { %s4094_s2 = sld [smem:[#allocation25_spill]] }
  0x1e   : > { %p3554_p13 = pneg %p3538_p11 }
  0x23   : > { %s3138_s21 = scalar_lea.hbm %s4094_s2, 1024 }
  0x24   : > { %p3139_p12 = scmp.ne.s32.totalorder %s4094_s2, %s3138_s21  ;;  %p3145_p5 = scmp.lt.u32.totalorder %s3138_s21, %s4094_s2 }
  0x26   : > { %p3141_p0 = pnand %p3554_p13, %p3139_p12 }
  0x28   : > { %p3142_p3 = pneg %p3141_p0 }
  0x2a   : > { %p3147_p7 = pnand %p3145_p5, %p3142_p3 }
  0x2c   : > { %3150 = shalt.err (!%p3147_p7)
}
  0x2d   : > { %s3151_s17 = scalar_lea.vmem %s3531_s13, 1024  ;;  %p3159_p2 = scmp.lt.s32.totalorder %s3531_s13, %s3531_s13 }
  0x2e   : > { %p3152_p9 = scmp.ne.s32.totalorder %s3531_s13, %s3151_s17  ;;  %p3160_p6 = scmp.lt.s32.totalorder %s3151_s17, %s3151_s17 }
  0x30   : > { %p3154_p10 = pnand %p3152_p9, %p3554_p13  ;;  %p3161_p12 = por %p3160_p6, %p3159_p2 }
  0x32   : > { %p3155_p1 = pneg %p3154_p10 }
  0x34   : > { %p3162_p0 = pnand %p3161_p12, %p3155_p1 }
  0x36   : > { %3165 = shalt.err (!%p3162_p0)
}
  0x37   : > { %s4081_s19 = smov 128   ;;  %s3414_s20 = smov 8  }
  0x38   : > { %2971 = dma.hbm_to_vmem [thread:$0]  (!%p3538_p11), %s4094_s2, 1024, %s3531_s13, [#allocation8], %s4081_s19, %s4081_s19, %s3414_s20  }
  0x39   : > { %s4096_s3 = sld [smem:[#allocation26_spill]] }
  0x3f   : > { %s3166_s15 = scalar_lea.hbm %s4096_s3, 768 }
  0x40   : > { %p3167_p1 = scmp.ne.s32.totalorder %s4096_s3, %s3166_s15  ;;  %p3173_p10 = scmp.lt.u32.totalorder %s3166_s15, %s4096_s3 }
  0x42   : > { %p3169_p2 = pnand %p3167_p1, %p3554_p13 }
  0x44   : > { %p3170_p6 = pneg %p3169_p2 }
  0x46   : > { %p3175_p3 = pnand %p3173_p10, %p3170_p6 }
  0x48   : > { %3178 = shalt.err (!%p3175_p3)
}
  0x49   : > { %s3179_s13 = scalar_lea.vmem %s3542_s16, 768  ;;  %p3187_p12 = scmp.lt.s32.totalorder %s3542_s16, %s3542_s16 }
  0x4a   : > { %p3180_p5 = scmp.ne.s32.totalorder %s3542_s16, %s3179_s13  ;;  %p3188_p0 = scmp.lt.s32.totalorder %s3179_s13, %s3179_s13 }
  0x4c   : > { %p3182_p7 = pnand %p3180_p5, %p3554_p13  ;;  %p3189_p1 = por %p3188_p0, %p3187_p12 }
  0x4e   : > { %p3183_p9 = pneg %p3182_p7 }
  0x50   : > { %p3190_p2 = pnand %p3189_p1, %p3183_p9 }
  0x52   : > { %3193 = shalt.err (!%p3190_p2)
}
  0x53   : > { %2974 = dma.hbm_to_vmem [thread:$0]  (!%p3538_p11), %s4096_s3, 768, %s3542_s16, [#allocation11], %s4081_s19, %s4081_s19, %s3414_s20  }
  0x54   : > { %s4097_s4 = sld [smem:[#allocation27_spill]] }
  0x5a   : > { %s3194_s22 = scalar_lea.hbm %s4097_s4, 768 }
  0x5b   : > { %p3195_p6 = scmp.ne.s32.totalorder %s4097_s4, %s3194_s22  ;;  %p3201_p5 = scmp.lt.u32.totalorder %s3194_s22, %s4097_s4 }
  0x5d   : > { %p3197_p10 = pnand %p3195_p6, %p3554_p13 }
  0x5f   : > { %p3198_p3 = pneg %p3197_p10 }
  0x61   : > { %p3203_p7 = pnand %p3201_p5, %p3198_p3 }
  0x63   : > { %3206 = shalt.err (!%p3203_p7)
}
  0x64   : > { %s3207_s13 = scalar_lea.vmem %s271_s18, 768  ;;  %p3215_p1 = scmp.lt.s32.totalorder %s271_s18, %s271_s18 }
  0x65   : > { %p3208_p9 = scmp.ne.s32.totalorder %s271_s18, %s3207_s13  ;;  %p3216_p2 = scmp.lt.s32.totalorder %s3207_s13, %s3207_s13 }
  0x67   : > { %p3210_p12 = pnand %p3208_p9, %p3554_p13  ;;  %p3217_p4 = por %p3216_p2, %p3215_p1 }
  0x69   : > { %p3211_p0 = pneg %p3210_p12 }
  0x6b   : > { %p3218_p8 = pnand %p3217_p4, %p3211_p0 }
  0x6d   : > { %3221 = shalt.err (!%p3218_p8)
}
  0x6e   : > { %2977 = dma.hbm_to_vmem [thread:$0]  (!%p3538_p11), %s4097_s4, 768, %s271_s18, [#allocation11], %s4081_s19, %s4081_s19, %s3414_s20  }
  0x6f   : > { %s3415_s24 = smov [#allocation13]   ;;  %s3222_s23 = scalar_lea.hbm %s4072_s5, 1024 }
  0x70   : > { %s283_s10 = sshll.u32 %s3415_s24, 4  ;;  %p3223_p4 = scmp.ne.s32.totalorder %s4072_s5, %s3222_s23  ;;  %s284_s10 = int_to_ptr.vmem [resolvable:$true] %s283_s10 }
  0x71   : > { %p3229_p10 = scmp.lt.u32.totalorder %s3222_s23, %s4072_s5 }
  0x72   : > { %p3225_p8 = pnand %p3223_p4, %p3554_p13 }
  0x74   : > { %p3226_p6 = pneg %p3225_p8 }
  0x76   : > { %p3231_p3 = pnand %p3229_p10, %p3226_p6 }
  0x78   : > { %3234 = shalt.err (!%p3231_p3)
}
  0x79   : > { %s3235_s18 = scalar_lea.vmem %s284_s10, 1024  ;;  %p3243_p12 = scmp.lt.s32.totalorder %s284_s10, %s284_s10 }
  0x7a   : > { %p3236_p5 = scmp.ne.s32.totalorder %s284_s10, %s3235_s18  ;;  %p3244_p0 = scmp.lt.s32.totalorder %s3235_s18, %s3235_s18 }
  0x7c   : > { %p3238_p7 = pnand %p3236_p5, %p3554_p13  ;;  %p3245_p1 = por %p3244_p0, %p3243_p12 }
  0x7e   : > { %p3239_p9 = pneg %p3238_p7 }
  0x80   : > { %p3246_p2 = pnand %p3245_p1, %p3239_p9 }
  0x82   : > { %3249 = shalt.err (!%p3246_p2)
}
  0x83   : > { %2980 = dma.hbm_to_vmem [thread:$0]  (!%p3538_p11), %s4072_s5, 1024, %s284_s10, [#allocation14], %s4081_s19, %s4081_s19, %s3414_s20  }
  0x84   : > { %s40_s8 = sadd.s32 1, %s3404_s28  ;;  %s49_s14 = sadd.s32 1, %s3396_s26 }
  0x85   : > { %p42_p13 = scmp.ge.s32.totalorder %s40_s8, 2  ;;  %p56_p4 = scmp.ne.s32.totalorder %s3396_s26, %s3392_s25 }
  0x86   : > { %p57_p8 = scmp.eq.s32.totalorder %s3408_s29, 0  ;;  %p2996_p6 = scmp.lt.s32.totalorder %s3408_s29, 2 }
  0x87   : > { %s4124_s8 = smov (%p42_p13, %s40_s8), 0  ;;  %p4098_p3 = scmp.eq.s32.totalorder %s3508_s30, 1 }
  0x88   : > { %p58_p10 = por %p57_p8, %p56_p4  ;;  %s44_s21 = ssub.s32 %s3404_s28, %s4124_s8 }
  0x89   : > { %p3657_p5 = por %p4098_p3, %p56_p4  ;;  %s3664_s22 = sand.u32 1, %s3396_s26  }
  0x8a   : > { %p47_p11 = scmp.eq.s32.totalorder %s44_s21, 0  ;;  %s2599_s10 = sshll.u32 %s3664_s22, 4 }
  0x8b   : > { %s4099_s24 = scalar_select %p3657_p5, 1, 0 }
  0x8c   : > { %s2664_s23 = sshll.u32 %s3404_s28, 8  ;;  %s4100_s0 = sld [smem:[#allocation24_spill]] }
  0x8d   : > { %s3669_s12 = scalar_select %p47_p11, %s3396_s26, %s49_s14  }
  0x8e   : > { %s304_s18 = scalar_lea.vmem [#allocation4], %s2599_s10  ;;  %p3678_p7 = pnand %p2996_p6, %p58_p10 }
  0x8f   : > { %s313_s16 = sshll.u32 %s304_s18, 4  ;;  %s301_s21 = scalar_lea.sflag [#allocation5], %s3664_s22  ;;  %s3682_s16 = int_to_ptr.vmem [resolvable:$true] %s313_s16 }
  0x90   : > { %p3252_p12 = pneg %p3678_p7 }
  0x92   : > { %s3674_s13 = scalar_lea.hbm %s4100_s0, %s2664_s23  ;;  %s3255_s17 = scalar_lea.hbm %s4100_s0, 512 }
  0x93   : > { %s3250_s15 = scalar_lea.hbm %s3674_s13, 256  ;;  %p3256_p2 = scmp.lt.u32.totalorder %s3674_s13, %s4100_s0 }
  0x94   : > { %p3251_p9 = scmp.ne.s32.totalorder %s3674_s13, %s3250_s15  ;;  %p3257_p13 = scmp.lt.u32.totalorder %s3255_s17, %s3250_s15 }
  0x95   : > { %p3259_p8 = scmp.lt.u32.totalorder %s3250_s15, %s3674_s13 }
  0x96   : > { %p3253_p0 = pnand %p3252_p12, %p3251_p9  ;;  %p3258_p4 = por %p3257_p13, %p3256_p2 }
  0x98   : > { %p3254_p1 = pneg %p3253_p0  ;;  %p3260_p6 = por %p3259_p8, %p3258_p4 }
  0x9a   : > { %p3261_p10 = pnand %p3260_p6, %p3254_p1 }
  0x9c   : > { %3264 = shalt.err (!%p3261_p10)
}
  0x9d   : > { %s3265_s14 = scalar_lea.vmem %s3682_s16, 256  ;;  %s3416_s10 = smov [#allocation4]  }
  0x9e   : > { %p3266_p3 = scmp.ne.s32.totalorder %s3682_s16, %s3265_s14  ;;  %s3270_s23 = sshll.u32 %s3416_s10, 4  ;;  %s3271_s23 = int_to_ptr.vmem [resolvable:$false] %s3270_s23 }
  0x9f   : > { %s3272_s19 = scalar_lea.vmem %s3271_s23, 512  ;;  %p3273_p0 = scmp.lt.s32.totalorder %s3682_s16, %s3271_s23 }
  0xa0   : > { %p3268_p11 = pnand %p3266_p3, %p3252_p12  ;;  %p3274_p2 = scmp.lt.s32.totalorder %s3272_s19, %s3265_s14 }
  0xa2   : > { %p3269_p9 = pneg %p3268_p11  ;;  %p3275_p13 = por %p3274_p2, %p3273_p0 }
  0xa4   : > { %p3276_p4 = pnand %p3275_p13, %p3269_p9 }
  0xa6   : > { %3279 = shalt.err (!%p3276_p4)
}
  0xa7   : > { %s4102_s15 = smov 128   ;;  %s2602_s17 = sshll.u32 %s3664_s22, 3 }
  0xa8   : > { %2984 = dma.hbm_to_vmem [thread:$0]  (!%p3678_p7), %s3674_s13, 256, %s3682_s16, %s301_s21, %s4102_s15, %s4102_s15, %s3414_s20  }
  0xa9   : > { %s2603_s18 = sshll.u32 %s3404_s28, 7  ;;  %s327_s19 = scalar_lea.vmem [#allocation7], %s2602_s17 }
  0xaa   : > { %s3721_s23 = scalar_lea.hbm %s4068_s1, %s2603_s18  ;;  %s334_s0 = sshll.u32 %s327_s19, 4  ;;  %s335_s0 = int_to_ptr.vmem [resolvable:$true] %s334_s0 }
  0xab   : > { %s4103_s2 = sand.u32 1, %s3408_s29   ;;  %s3280_s4 = scalar_lea.hbm %s3721_s23, 128 }
  0xac   : > { %s324_s3 = scalar_lea.sflag [#allocation8], %s4103_s2  ;;  %p3281_p1 = scmp.ne.s32.totalorder %s3721_s23, %s3280_s4 }
  0xad   : > { %s3285_s13 = scalar_lea.hbm %s4068_s1, 256  ;;  %p3286_p10 = scmp.lt.u32.totalorder %s3721_s23, %s4068_s1 }
  0xae   : > { %p3283_p8 = pnand %p3281_p1, %p3252_p12  ;;  %p3287_p3 = scmp.lt.u32.totalorder %s3285_s13, %s3280_s4 }
  0xaf   : > { %p3289_p9 = scmp.lt.u32.totalorder %s3280_s4, %s3721_s23 }
  0xb0   : > { %p3284_p6 = pneg %p3283_p8  ;;  %p3288_p11 = por %p3287_p3, %p3286_p10 }
  0xb2   : > { %p3290_p0 = por %p3289_p9, %p3288_p11 }
  0xb4   : > { %p3291_p2 = pnand %p3290_p0, %p3284_p6 }
  0xb6   : > { %3294 = shalt.err (!%p3291_p2)
}
  0xb7   : > { %s3295_s2 = scalar_lea.vmem %s335_s0, 128  ;;  %s3417_s15 = smov [#allocation7]  }
  0xb8   : > { %p3296_p13 = scmp.ne.s32.totalorder %s335_s0, %s3295_s2  ;;  %s3300_s17 = sshll.u32 %s3417_s15, 4  ;;  %s3301_s17 = int_to_ptr.vmem [resolvable:$false] %s3300_s17 }
  0xb9   : > { %s3302_s18 = scalar_lea.vmem %s3301_s17, 256  ;;  %p3303_p8 = scmp.lt.s32.totalorder %s335_s0, %s3301_s17 }
  0xba   : > { %p3298_p4 = pnand %p3296_p13, %p3252_p12  ;;  %p3304_p5 = scmp.lt.s32.totalorder %s3302_s18, %s3295_s2 }
  0xbc   : > { %p3299_p1 = pneg %p3298_p4  ;;  %p3305_p3 = por %p3304_p5, %p3303_p8 }
  0xbe   : > { %p3306_p10 = pnand %p3305_p3, %p3299_p1 }
  0xc0   : > { %3309 = shalt.err (!%p3306_p10)
}
  0xc1   : > { %2987 = dma.hbm_to_vmem [thread:$0]  (!%p3678_p7), %s3721_s23, 128, %s335_s0, %s324_s3  }
  0xc2   : > { %p4104_p6 = scmp.ne.s32.totalorder %s4092_s11, 0 }
  0xc3   : > { %s3747_s4 = sand.u32 (!%p4104_p6), 1, %s3392_s25   ;;  %p4105_p5 = scmp.ne.s32.totalorder (!%p4104_p6), %s4089_s9, 0 }
  0xc4   : > { %343 = sbr.rel (%p4104_p6) target bundleno = 1547 (0x60b), region = 48  ;;  %s2605_s14 = sshll.u32 (!%p4104_p6), %s3747_s4, 4 }
  0xc5   : > { %s346_s10 = scalar_lea.sflag (!%p4104_p6), [#allocation5], %s3747_s4  ;;  %s3753_s19 = scalar_lea.vmem (!%p4104_p6), [#allocation4], %s2605_s14 }
  0xcb   : > { %3363 = dma.done.wait (%p4105_p5), %s346_s10, 256  }
  0xcc   : > { %3365 = vsyncadd (%p4105_p5), %s346_s10, 4294967040  ;;  %s354_s0 = sand.u32 1, %s3508_s30   ;;  %s2606_s3 = sshll.u32 %s3747_s4, 3 }
  0xcd   : > { %s355_s11 = scalar_lea.sflag [#allocation8], %s354_s0  ;;  %s3761_s7 = scalar_lea.vmem [#allocation7], %s2606_s3 }
  0xce   : > { %3367 = dma.done.wait (%p4105_p5), %s355_s11, 128  }
  0xcf   : > { %3369 = vsyncadd (%p4105_p5), %s355_s11, 4294967168  ;;  %p4106_p7 = scmp.eq.s32.totalorder %s3508_s30, 0 }
  0xd1   : > { %3371 = dma.done.wait (%p4106_p7), [#allocation8], 1024   ;;  %p4107_p12 = pmov %p4106_p7 }
  0xd2   : > { %p4108_p11 = pmov %p4106_p7 }
  0xd3   : > { %3373 = vsyncadd (%p4107_p12), [#allocation8], 4294966272 }
  0xd4   : > { %3375 = dma.done.wait (%p4108_p11), [#allocation11], 1536   ;;  %p4109_p9 = pmov %p4106_p7 }
  0xd5   : > { %p4110_p0 = pmov %p4106_p7 }
  0xd6   : > { %3377 = vsyncadd (%p4109_p9), [#allocation11], 4294965760 }
  0xd7   : > { %3379 = dma.done.wait (%p4110_p0), [#allocation14], 1024   ;;  %p4111_p2 = pmov %p4110_p0 }
  0xd8   : > { %v3418_v0 = vmov 0.0|0.0   ;;  %vm3419_vm0 = vmmov 0   ;;  %v3420_v1 = vmov 0.0   ;;  %v417_v2 = vld [vmem:[#allocation10] sm:$0xff]  ;;  %v418_v3 = vld [vmem:[#allocation10 + $0x8] sm:$0xff]  ;;  %v419_v7 = vld [vmem:[#allocation10 + $0x10] sm:$0xff] }
  0xd9   : > { %3381 = vsyncadd (%p4111_p2), [#allocation14], 4294966272  ;;  %2896 = vmatprep.subr.bf16.mxu1 %v3418_v0  ;;  %2760 = vmatprep.mubr.msk.f32.mxu1 %vm3419_vm0, %v3420_v1  ;;  %v636_v4 = vld [vmem:[#allocation9] sm:$0xff]  ;;  %v2897_v5 = vpack.c.bf16 %v418_v3, %v417_v2  ;;  %v637_v6 = vld [vmem:[#allocation9 + $0x8] sm:$0xff]  ;;  %vm644_vm1 = vcmask 523264   ;;  %vm423_vm2 = vcmask 392192  }
  0xda   : > { %v420_v8 = vld [vmem:[#allocation10 + $0x18] sm:$0xff]  ;;  %v2914_v9 = vpack.c.bf16 %v637_v6, %v636_v4  ;;  %v638_v10 = vld [vmem:[#allocation9 + $0x10] sm:$0xff]  ;;  %v640_v14 = vld [vmem:[#allocation9 + $0x20] sm:$0xff]  ;;  %vm595_vm3 = vcmask 64512   ;;  %s3421_s30 = smov 104   ;;  %s3422_s9 = smov 120  }
  0xdb   : > { %v639_v11 = vld [vmem:[#allocation9 + $0x18] sm:$0xff]  ;;  %2898 = vmatpush3.bf16.msra.mxu1 %v2897_v5  ;;  %v2900_v12 = vpack.c.bf16 %v420_v8, %v419_v7  ;;  %v641_v15 = vld [vmem:[#allocation9 + $0x28] sm:$0xff]  ;;  %v421_v16 = vld [vmem:[#allocation10 + $0x20] sm:$0xff]  ;;  %s3423_s23 = smov 96   ;;  %s3424_s20 = smov 112   ;;  %vm2311_vm4 = vcmask 130048  }
  0xdc   : > { %v2918_v13 = vpack.c.bf16 %v639_v11, %v638_v10  ;;  %2915 = vmatprep.subr.bf16.mxu0 %v2914_v9  ;;  %2899 = vmatprep.subr.bf16.mxu1 %v3418_v0  ;;  %v422_v17 = vld [vmem:[#allocation10 + $0x28] sm:$0xff]  ;;  %v634_v18 = vld [vmem:[%s3753_s19] sm:$0xff]  ;;  %v2922_v19 = vpack.c.bf16 %v641_v15, %v640_v14  ;;  %v643_v22 = vld [vmem:[#allocation9 + $0x38] sm:$0xff]  ;;  %s3425_s22 = smov 88   ;;  %s3426_s13 = smov 80   ;;  %vm2314_vm5 = vcmask 195584  }
  0xdd   : > { %2917 = vmatpush3.bf16.msra.mxu0 %v2914_v9  ;;  %2794 = vmatprep.mubr.msk.f32.mxu0 %vm644_vm1, %v634_v18  ;;  %v2903_v20 = vpack.c.bf16 %v422_v17, %v421_v16  ;;  %v642_v21 = vld [vmem:[#allocation9 + $0x30] sm:$0xff]  ;;  %v498_v24 = vld [vmem:[#allocation12 + $0x8] sm:$0xff]  ;;  %v499_v28 = vld [vmem:[#allocation12 + $0x10] sm:$0xff]  ;;  %s3427_s16 = smov 72   ;;  %s3428_s21 = smov 8   ;;  %vm2317_vm6 = vcmask 261120  }
  0xde   : > { %2919 = vmatprep.subr.bf16.mxu0 %v2918_v13  ;;  %v497_v23 = vld [vmem:[#allocation12] sm:$0xff]  ;;  %v2926_v25 = vpack.c.bf16 %v643_v22, %v642_v21  ;;  %v500_v29 = vld [vmem:[#allocation12 + $0x18] sm:$0xff]  ;;  %v502_v32 = vld [vmem:[#allocation12 + $0x28] sm:$0xff]  ;;  %s3429_s2 = smov 16   ;;  %s3430_s15 = smov 24   ;;  %vm2320_vm7 = vcmask 326656  }
  0xdf   : > { %2901 = vmatpush3.bf16.msra.mxu1 %v2900_v12  ;;  %v416_v26 = vld [vmem:[%s3761_s7] sm:$0xff]  ;;  %v2906_v27 = vpack.c.bf16 %v498_v24, %v497_v23  ;;  %v2909_v30 = vpack.c.bf16 %v500_v29, %v499_v28  ;;  %v635_v33 = vld [vmem:[%s3753_s19 + $0x8] sm:$0xff]  ;;  %s3431_s17 = smov 32   ;;  %s3432_s18 = smov 40   ;;  %vm2326_vm8 = vcmask 457728  }
  0xe0   : > { %2902 = vmatprep.subr.bf16.mxu1 %v3418_v0  ;;  %v501_v31 = vld [vmem:[#allocation12 + $0x20] sm:$0xff]  ;;  %s3433_s10 = smov 48   ;;  %s3434_s19 = smov 56  }
  0xe1   : > { %2921 = vmatpush3.bf16.msra.mxu0 %v2918_v13  ;;  %v2912_v34 = vpack.c.bf16 %v502_v32, %v501_v31  ;;  %s409_s11 = scalar_lea.vmem [#allocation15], %s2605_s14  ;;  %s2428_s14 = scalar_lea.sflag [#allocation6], %s3747_s4 }
  0xe2   : > { %2923 = vmatprep.subr.bf16.mxu0 %v2922_v19  ;;  %s2443_s7 = sshll.u32 %s409_s11, 4  ;;  %p4113_p4 = scmp.ne.s32.totalorder %s4099_s24, 0  ;;  %s4010_s7 = int_to_ptr.vmem [resolvable:$true] %s2443_s7 }
  0xe3   : > { %2904 = vmatpush3.bf16.msra.mxu1 %v2903_v20 }
  0xe4   : > { %2905 = vmatprep.subr.bf16.mxu1 %v3418_v0 }
  0xe5   : > { %2925 = vmatpush3.bf16.msra.mxu0 %v2922_v19 }
  0xe6   : > { %2761 = vmatmul.mubr.msk.f32.vlgmr.msra.gmra.mrb[0].mxu1 %vm423_vm2, %v416_v26  ;;  %2927 = vmatprep.subr.bf16.mxu0 %v2926_v25 }
  0xe7   : > { %2907 = vmatpush3.bf16.msra.mxu1 %v2906_v27  ;;  %2775 = vmatprep.mubr.msk.f32.mxu1 %vm3419_vm0, %v3420_v1 }
  0xe8   : > { %2908 = vmatprep.subr.bf16.mxu1 %v3418_v0 }
  0xe9   : > { %2929 = vmatpush3.bf16.msra.mxu0 %v2926_v25 }
  0xeb   : > { %2910 = vmatpush3.bf16.msra.mxu1 %v2909_v30 }
  0xec   : > { %2795 = vmatmul.mubr.msk.f32.vlgmr.msra.gmra.mrb[0].mxu0 %vm644_vm1, %v635_v33  ;;  %2911 = vmatprep.subr.bf16.mxu1 %v3418_v0 }
  0xef   : > { %2913 = vmatpush3.bf16.msra.mxu1 %v2912_v34 }
  0xf2   : > { %2776 = vmatmul.mubr.msk.f32.vlgmr.msra.gmra.mrb[2].mxu1 %vm423_vm2, %v416_v26 }
 0x1b9   : > { %v493_v35 = vpop.f32.mrb[0].mxu1 }
 0x1ba   : > { %596 = vst.msk [vmem:[#allocation2] sm:$0xff] %vm595_vm3, %v493_v35  ;;  %580 = vrot.lane.b32.xlu1 %v493_v35, %s3421_s30  ;;  %574 = vrot.lane.b32.xlu0 %v493_v35, %s3422_s9  ;;  %v2762_v36 = vpop.f32.mrb[1].mxu1 }
 0x1be   : > { %583 = vrot.lane.b32.xlu1 %v493_v35, %s3423_s23  ;;  %577 = vrot.lane.b32.xlu0 %v493_v35, %s3424_s20 }
 0x1bf   : > { %v2796_v37 = vpop.f32.mrb[0].mxu0 }
 0x1c0   : > { %v717_v38 = vpop.f32.mrb[1].mxu0 }
 0x1c1   : > { %2799 = vmatprep.mubr.msk.f32.mxu0 %vm595_vm3, %v717_v38  ;;  %v756_v39 = vld [vmem:[#allocation2] sm:$0xff] }
 0x1c2   : > { %586 = vrot.lane.b32.xlu1 %v493_v35, %s3425_s22  ;;  %730 = vrot.lane.b32.xlu0 %v2796_v37, %s3422_s9 }
 0x1c3   : > { %2797 = vmatprep.subr.msk.mxu0 %vm595_vm3, %v756_v39 }
 0x1c4   : > { %2798 = vmatpush3.xpose.msk.msra.mxu0 %vm595_vm3, %v756_v39 }
 0x1c5   : > { %v3806_v40 = vpop.f32.mrb[2].mxu1 }
 0x1c6   : > { %589 = vrot.lane.b32.xlu1 %v493_v35, %s3426_s13  ;;  %734 = vrot.lane.b32.xlu0 %v2796_v37, %s3424_s20  ;;  %626 = vst.msk [vmem:[#allocation3] sm:$0xff] %vm595_vm3, %v3806_v40  ;;  %v2777_v41 = vpop.f32.mrb[3].mxu1 }
 0x1c7   : > { %2800 = vmatmul.mubr.msk.f32.vlgmr.msra.gmra.mrb[2].mxu0 %vm595_vm3, %v2796_v37 }
 0x1ca   : > { %592 = vrot.lane.b32.xlu1 %v493_v35, %s3427_s16  ;;  %738 = vrot.lane.b32.xlu0 %v2796_v37, %s3421_s30 }
 0x1cd   : > { %v1565_v0 = vld [vmem:[#allocation3] sm:$0xff] }
 0x1ce   : > { %736 = vrot.lane.b32.xlu1 %v717_v38, %s3421_s30  ;;  %728 = vrot.lane.b32.xlu0 %v717_v38, %s3422_s9 }
 0x1d2   : > { %740 = vrot.lane.b32.xlu1 %v717_v38, %s3423_s23  ;;  %732 = vrot.lane.b32.xlu0 %v717_v38, %s3424_s20 }
 0x1d6   : > { %744 = vrot.lane.b32.xlu1 %v717_v38, %s3425_s22  ;;  %742 = vrot.lane.b32.xlu0 %v2796_v37, %s3423_s23 }
 0x1da   : > { %748 = vrot.lane.b32.xlu1 %v717_v38, %s3426_s13  ;;  %746 = vrot.lane.b32.xlu0 %v2796_v37, %s3425_s22 }
 0x1de   : > { %752 = vrot.lane.b32.xlu1 %v717_v38, %s3427_s16  ;;  %750 = vrot.lane.b32.xlu0 %v2796_v37, %s3426_s13 }
 0x1e2   : > { %754 = vrot.lane.b32.xlu0 %v2796_v37, %s3427_s16  ;;  %608 = vrot.lane.b32.xlu1 %v3806_v40, %s3424_s20  ;;  %s4112_s20 = sld [smem:[#allocation28_spill]] }
 0x1e6   : > { %611 = vrot.lane.b32.xlu1 %v3806_v40, %s3421_s30  ;;  %605 = vrot.lane.b32.xlu0 %v3806_v40, %s3422_s9  ;;  %s2665_s30 = sshll.u32 %s3400_s27, 8  ;;  %s3310_s27 = scalar_lea.vmem %s4010_s7, 256 }
 0x1e7   : > { %p3311_p13 = scmp.ne.s32.totalorder %s4010_s7, %s3310_s27 }
 0x1e9   : > { %p3312_p1 = pnand %p3311_p13, %p4113_p4 }
 0x1ea   : > { %617 = vrot.lane.b32.xlu1 %v3806_v40, %s3425_s22  ;;  %614 = vrot.lane.b32.xlu0 %v3806_v40, %s3423_s23  ;;  %s4015_s22 = scalar_lea.hbm %s4112_s20, %s2665_s30 }
 0x1eb   : > { %p3313_p8 = pneg %p3312_p1 }
 0x22c   : > { %v581_v42 = vpop.permute.xlu1 %580  ;;  %v575_v43 = vpop.permute.xlu0 %574 }
 0x22d   : > { %599 = vst.msk [vmem:[#allocation2 + $0x18] sm:$0xff] %vm595_vm3, %v581_v42  ;;  %597 = vst.msk [vmem:[#allocation2 + $0x8] sm:$0xff] %vm595_vm3, %v575_v43 }
 0x230   : > { %v584_v44 = vpop.permute.xlu1 %583  ;;  %v578_v45 = vpop.permute.xlu0 %577 }
 0x231   : > { %600 = vst.msk [vmem:[#allocation2 + $0x20] sm:$0xff] %vm595_vm3, %v584_v44  ;;  %598 = vst.msk [vmem:[#allocation2 + $0x10] sm:$0xff] %vm595_vm3, %v578_v45 }
 0x234   : > { %v587_v46 = vpop.permute.xlu1 %586  ;;  %v731_v47 = vpop.permute.xlu0 %730  ;;  %v757_v48 = vld [vmem:[#allocation2 + $0x8] sm:$0xff]  ;;  %v759_v58 = vld [vmem:[#allocation2 + $0x18] sm:$0xff] }
 0x235   : > { %601 = vst.msk [vmem:[#allocation2 + $0x28] sm:$0xff] %vm595_vm3, %v587_v46  ;;  %2802 = vmatprep.subr.msk.mxu1 %vm595_vm3, %v757_v48 }
 0x236   : > { %2803 = vmatpush3.xpose.msk.msra.mxu1 %vm595_vm3, %v757_v48 }
 0x238   : > { %v590_v49 = vpop.permute.xlu1 %589  ;;  %v735_v50 = vpop.permute.xlu0 %734  ;;  %v758_v51 = vld [vmem:[#allocation2 + $0x10] sm:$0xff]  ;;  %v760_v52 = vld [vmem:[#allocation2 + $0x20] sm:$0xff] }
 0x239   : > { %602 = vst.msk [vmem:[#allocation2 + $0x30] sm:$0xff] %vm595_vm3, %v590_v49  ;;  %2807 = vmatprep.subr.msk.mxu1 %vm595_vm3, %v758_v51  ;;  %2817 = vmatprep.subr.msk.mxu0 %vm595_vm3, %v760_v52 }
 0x23a   : > { %2818 = vmatpush3.xpose.msk.msra.mxu0 %vm595_vm3, %v760_v52 }
 0x23c   : > { %v593_v53 = vpop.permute.xlu1 %592  ;;  %v739_v54 = vpop.permute.xlu0 %738  ;;  %v761_v61 = vld [vmem:[#allocation2 + $0x28] sm:$0xff] }
 0x23d   : > { %603 = vst.msk [vmem:[#allocation2 + $0x38] sm:$0xff] %vm595_vm3, %v593_v53 }
 0x240   : > { %v737_v55 = vpop.permute.xlu1 %736  ;;  %v729_v56 = vpop.permute.xlu0 %728  ;;  %v762_v57 = vld [vmem:[#allocation2 + $0x30] sm:$0xff] }
 0x241   : > { %2804 = vmatprep.mubr.msk.f32.mxu1 %vm595_vm3, %v729_v56  ;;  %2827 = vmatprep.subr.msk.mxu0 %vm595_vm3, %v762_v57 }
 0x242   : > { %2805 = vmatmul.mubr.msk.f32.vlgmr.msra.gmra.mrb[4].mxu1 %vm595_vm3, %v731_v47 }
 0x243   : > { %2808 = vmatpush3.xpose.msk.msra.mxu1 %vm595_vm3, %v758_v51 }
 0x244   : > { %2812 = vmatprep.subr.msk.mxu1 %vm595_vm3, %v759_v58  ;;  %v741_v59 = vpop.permute.xlu1 %740  ;;  %v733_v60 = vpop.permute.xlu0 %732  ;;  %v763_v1 = vld [vmem:[#allocation2 + $0x38] sm:$0xff] }
 0x245   : > { %2809 = vmatprep.mubr.msk.f32.mxu1 %vm595_vm3, %v733_v60  ;;  %2819 = vmatprep.mubr.msk.f32.mxu0 %vm595_vm3, %v741_v59 }
 0x246   : > { %2810 = vmatmul.mubr.msk.f32.vlgmr.msra.gmra.mrb[6].mxu1 %vm595_vm3, %v735_v50 }
 0x247   : > { %2813 = vmatpush3.xpose.msk.msra.mxu1 %vm595_vm3, %v759_v58  ;;  %2814 = vmatprep.mubr.msk.f32.mxu1 %vm595_vm3, %v737_v55 }
 0x248   : > { %2822 = vmatprep.subr.msk.mxu1 %vm595_vm3, %v761_v61  ;;  %v745_v62 = vpop.permute.xlu1 %744  ;;  %v743_v63 = vpop.permute.xlu0 %742 }
 0x249   : > { %2820 = vmatmul.mubr.msk.f32.vlgmr.msra.gmra.mrb[4].mxu0 %vm595_vm3, %v743_v63 }
 0x24a   : > { %2828 = vmatpush3.xpose.msk.msra.mxu0 %vm595_vm3, %v762_v57  ;;  %2815 = vmatmul.mubr.msk.f32.vlgmr.msra.gmra.mrb[8].mxu1 %vm595_vm3, %v739_v54 }
 0x24b   : > { %2823 = vmatpush3.xpose.msk.msra.mxu1 %vm595_vm3, %v761_v61  ;;  %2824 = vmatprep.mubr.msk.f32.mxu1 %vm595_vm3, %v745_v62 }
 0x24c   : > { %2832 = vmatprep.subr.msk.mxu1 %vm595_vm3, %v763_v1  ;;  %v749_v2 = vpop.permute.xlu1 %748  ;;  %v747_v3 = vpop.permute.xlu0 %746  ;;  %2837 = vmatprep.subr.mxu0 %v1565_v0 }
 0x24d   : > { %2829 = vmatprep.mubr.msk.f32.mxu0 %vm595_vm3, %v749_v2 }
 0x24e   : > { %2825 = vmatmul.mubr.msk.f32.vlgmr.msra.gmra.mrb[10].mxu1 %vm595_vm3, %v747_v3 }
 0x24f   : > { %2833 = vmatpush3.xpose.msk.msra.mxu1 %vm595_vm3, %v763_v1 }
 0x250   : > { %v753_v4 = vpop.permute.xlu1 %752  ;;  %v751_v5 = vpop.permute.xlu0 %750 }
 0x251   : > { %2830 = vmatmul.mubr.msk.f32.vlgmr.msra.gmra.mrb[6].mxu0 %vm595_vm3, %v751_v5  ;;  %2834 = vmatprep.mubr.msk.f32.mxu1 %vm595_vm3, %v753_v4 }
 0x252   : > { %2838 = vmatpush3.msra.mxu0 %v1565_v0 }
 0x254   : > { %v755_v6 = vpop.permute.xlu0 %754  ;;  %v609_v11 = vpop.permute.xlu1 %608 }
 0x255   : > { %2835 = vmatmul.mubr.msk.f32.vlgmr.msra.gmra.mrb[12].mxu1 %vm595_vm3, %v755_v6  ;;  %628 = vst.msk [vmem:[#allocation3 + $0x10] sm:$0xff] %vm595_vm3, %v609_v11 }
 0x258   : > { %v606_v12 = vpop.permute.xlu0 %605  ;;  %v612_v13 = vpop.permute.xlu1 %611 }
 0x259   : > { %627 = vst.msk [vmem:[#allocation3 + $0x8] sm:$0xff] %vm595_vm3, %v606_v12  ;;  %629 = vst.msk [vmem:[#allocation3 + $0x18] sm:$0xff] %vm595_vm3, %v612_v13 }
 0x25c   : > { %v615_v14 = vpop.permute.xlu0 %614  ;;  %v618_v15 = vpop.permute.xlu1 %617  ;;  %v1567_v17 = vld [vmem:[#allocation3 + $0x10] sm:$0xff] }
 0x25d   : > { %630 = vst.msk [vmem:[#allocation3 + $0x20] sm:$0xff] %vm595_vm3, %v615_v14  ;;  %631 = vst.msk [vmem:[#allocation3 + $0x28] sm:$0xff] %vm595_vm3, %v618_v15  ;;  %2847 = vmatprep.subr.mxu0 %v1567_v17 }
 0x260   : > { %v1566_v16 = vld [vmem:[#allocation3 + $0x8] sm:$0xff]  ;;  %v3866_v18 = vld [vmem:[#allocation3 + $0x18] sm:$0xff] }
 0x261   : > { %2842 = vmatprep.subr.mxu1 %v1566_v16 }
 0x262   : > { %2843 = vmatpush3.msra.mxu1 %v1566_v16 }
 0x263   : > { %2852 = vmatprep.subr.mxu1 %v3866_v18 }
 0x264   : > { %v3931_v56 = vld [vmem:[#allocation3 + $0x20] sm:$0xff] }
 0x29a   : > { %v2801_v7 = vpop.f32.mrb[2].mxu0 }
 0x29b   : > { %v838_v8 = vpop.f32.mrb[3].mxu0  ;;  %v1424_v9 = vsel %vm595_vm3, %v2801_v7, -inf }
 0x29c   : > { %1425 = vmax.xlane.f32.xlu0 %v1424_v9  ;;  %v1421_v10 = vsel %vm595_vm3, %v838_v8, -inf }
 0x29d   : > { %1422 = vmax.xlane.f32.xlu1 %v1421_v10 }
 0x315   : > { %v3869_v19 = vpop.f32.mrb[4].mxu1 }
 0x316   : > { %v3871_v20 = vpop.f32.mrb[5].mxu1  ;;  %v1430_v21 = vsel %vm595_vm3, %v3869_v19, -inf }
 0x317   : > { %1431 = vmax.xlane.f32.xlu1 %v1430_v21  ;;  %v1427_v22 = vsel %vm595_vm3, %v3871_v20, -inf }
 0x318   : > { %1428 = vmax.xlane.f32.xlu0 %v1427_v22 }
 0x319   : > { %v3877_v23 = vpop.f32.mrb[6].mxu1 }
 0x31a   : > { %v3879_v24 = vpop.f32.mrb[7].mxu1  ;;  %v1436_v32 = vsel %vm595_vm3, %v3877_v23, -inf }
 0x31b   : > { %v1433_v34 = vsel %vm595_vm3, %v3879_v24, -inf }
 0x31c   : > { %v3881_v25 = vpop.f32.mrb[4].mxu0 }
 0x31d   : > { %v3883_v26 = vpop.f32.mrb[5].mxu0  ;;  %v3885_v27 = vpop.f32.mrb[8].mxu1  ;;  %v1448_v28 = vsel %vm595_vm3, %v3881_v25, -inf }
 0x31e   : > { %1449 = vmax.xlane.f32.xlu1 %v1448_v28  ;;  %v3889_v29 = vpop.f32.mrb[9].mxu1  ;;  %v1445_v30 = vsel %vm595_vm3, %v3883_v26, -inf  ;;  %v1442_v43 = vsel %vm595_vm3, %v3885_v27, -inf }
 0x31f   : > { %1446 = vmax.xlane.f32.xlu0 %v1445_v30  ;;  %v1439_v46 = vsel %vm595_vm3, %v3889_v29, -inf }
 0x321   : > { %v3893_v31 = vpop.f32.mrb[10].mxu1 }
 0x322   : > { %1437 = vmax.xlane.f32.xlu1 %v1436_v32  ;;  %v3897_v33 = vpop.f32.mrb[11].mxu1  ;;  %v1454_v50 = vsel %vm595_vm3, %v3893_v31, -inf }
 0x323   : > { %1434 = vmax.xlane.f32.xlu0 %v1433_v34  ;;  %v1451_v51 = vsel %vm595_vm3, %v3897_v33, -inf }
 0x324   : > { %v3901_v35 = vpop.f32.mrb[6].mxu0 }
 0x325   : > { %v3903_v36 = vpop.f32.mrb[7].mxu0  ;;  %v1460_v37 = vsel %vm595_vm3, %v3901_v35, -inf }
 0x326   : > { %1461 = vmax.xlane.f32.xlu1 %v1460_v37  ;;  %v1457_v38 = vsel %vm595_vm3, %v3903_v36, -inf }
 0x327   : > { %1458 = vmax.xlane.f32.xlu0 %v1457_v38 }
 0x328   : > { %v3909_v39 = vpop.f32.mrb[12].mxu1 }
 0x329   : > { %v1426_v41 = vpop.xlane.xlu0 %1425  ;;  %v3911_v42 = vpop.f32.mrb[13].mxu1  ;;  %v1466_v52 = vsel %vm595_vm3, %v3909_v39, -inf }
 0x32a   : > { %v1470_v44 = vsub.f32 %v2801_v7, %v1426_v41  ;;  %v1423_v45 = vpop.xlane.xlu1 %1422  ;;  %1443 = vmax.xlane.f32.xlu1 %v1442_v43  ;;  %v1463_v53 = vsel %vm595_vm3, %v3911_v42, -inf }
 0x32b   : > { %v1469_v47 = vsub.f32 %v838_v8, %v1423_v45  ;;  %1440 = vmax.xlane.f32.xlu0 %v1439_v46 }
 0x32c   : > { %v1487_v48 = vmul.f32 1.442695, %v1470_v44 }
 0x32d   : > { %v1485_v49 = vmul.f32 1.442695, %v1469_v47 }
 0x32e   : > { %1455 = vmax.xlane.f32.xlu1 %v1454_v50 }
 0x32f   : > { %3074 = vpow2.f32 %v1485_v49  ;;  %1452 = vmax.xlane.f32.xlu0 %v1451_v51 }
 0x330   : > { %3076 = vpow2.f32 %v1487_v48 }
 0x332   : > { %1467 = vmax.xlane.f32.xlu1 %v1466_v52 }
 0x333   : > { %1464 = vmax.xlane.f32.xlu0 %v1463_v53 }
 0x339   : > { %v3925_v54 = vpop.eup %3074 }
 0x33a   : > { %v3927_v55 = vpop.eup %3076  ;;  %2839 = vmatprep.mubr.msk.f32.mxu0 %vm595_vm3, %v3925_v54 }
 0x33b   : > { %2840 = vmatmul.mubr.msk.f32.vlgmr.msra.gmra.mrb[8].mxu0 %vm595_vm3, %v3927_v55 }
 0x33c   : > { %2848 = vmatpush3.msra.mxu0 %v1567_v17 }
 0x33d   : > { %2857 = vmatprep.subr.mxu0 %v3931_v56 }
 0x343   : > { %623 = vrot.lane.b32.xlu1 %v3806_v40, %s3427_s16 }
 0x349   : > { %620 = vrot.lane.b32.xlu0 %v3806_v40, %s3426_s13  ;;  %s3435_s13 = smov [#allocation15]  }
 0x34a   : > { %s3314_s16 = sshll.u32 %s3435_s13, 4  ;;  %s3315_s16 = int_to_ptr.vmem [resolvable:$false] %s3314_s16 }
 0x34b   : > { %p3317_p3 = scmp.lt.s32.totalorder %s4010_s7, %s3315_s16 }
 0x3a4   : > { %v1432_v57 = vpop.xlane.xlu1 %1431 }
 0x3a5   : > { %v1472_v58 = vsub.f32 %v3869_v19, %v1432_v57  ;;  %v1429_v59 = vpop.xlane.xlu0 %1428 }
 0x3a6   : > { %v1471_v60 = vsub.f32 %v3871_v20, %v1429_v59  ;;  %v1570_v20 = vld [vmem:[#allocation3 + $0x28] sm:$0xff] }
 0x3a7   : > { %v1491_v61 = vmul.f32 1.442695, %v1472_v58 }
 0x3a8   : > { %v1489_v62 = vmul.f32 1.442695, %v1471_v60 }
 0x3a9   : > { %3078 = vpow2.f32 %v1491_v61 }
 0x3aa   : > { %3080 = vpow2.f32 %v1489_v62 }
 0x3ab   : > { %v1450_v63 = vpop.xlane.xlu1 %1449 }
 0x3ac   : > { %v1478_v0 = vsub.f32 %v3881_v25, %v1450_v63  ;;  %v1447_v1 = vpop.xlane.xlu0 %1446 }
 0x3ad   : > { %v1477_v2 = vsub.f32 %v3883_v26, %v1447_v1 }
 0x3ae   : > { %v1503_v3 = vmul.f32 1.442695, %v1478_v0 }
 0x3af   : > { %v1501_v4 = vmul.f32 1.442695, %v1477_v2  ;;  %v1438_v5 = vpop.xlane.xlu1 %1437 }
 0x3b0   : > { %3082 = vpow2.f32 %v1503_v3  ;;  %v1474_v40 = vsub.f32 %v3877_v23, %v1438_v5  ;;  %v1435_v6 = vpop.xlane.xlu0 %1434  ;;  %v1517_v5 = vsel %vm595_vm3, %v3925_v54, 0.0 }
 0x3b1   : > { %3084 = vpow2.f32 %v1501_v4  ;;  %v1473_v7 = vsub.f32 %v3879_v24, %v1435_v6  ;;  %v1520_v6 = vsel %vm595_vm3, %v3927_v55, 0.0 }
 0x3b2   : > { %v1495_v8 = vmul.f32 1.442695, %v1474_v40 }
 0x3b3   : > { %v3079_v9 = vpop.eup %3078  ;;  %v1493_v10 = vmul.f32 1.442695, %v1473_v7  ;;  %v1462_v11 = vpop.xlane.xlu1 %1461 }
 0x3b4   : > { %v3081_v12 = vpop.eup %3080  ;;  %v1482_v13 = vsub.f32 %v3901_v35, %v1462_v11  ;;  %v1459_v14 = vpop.xlane.xlu0 %1458  ;;  %v1526_v15 = vsel %vm595_vm3, %v3079_v9, 0.0 }
 0x3b5   : > { %3086 = vpow2.f32 %v1493_v10  ;;  %v1481_v16 = vsub.f32 %v3903_v36, %v1459_v14  ;;  %2844 = vmatprep.mubr.msk.f32.mxu1 %vm595_vm3, %v3081_v12  ;;  %1527 = vadd.xlane.f32.xlu1 %v1526_v15  ;;  %v1523_v43 = vsel %vm595_vm3, %v3081_v12, 0.0 }
 0x3b6   : > { %3088 = vpow2.f32 %v1495_v8  ;;  %v1511_v17 = vmul.f32 1.442695, %v1482_v13  ;;  %2845 = vmatmul.mubr.msk.f32.vlgmr.msra.gmra.mrb[14].mxu1 %vm595_vm3, %v3079_v9 }
 0x3b7   : > { %v1509_v19 = vmul.f32 1.442695, %v1481_v16  ;;  %2853 = vmatpush3.msra.mxu1 %v3866_v18  ;;  %v1444_v21 = vpop.xlane.xlu1 %1443 }
 0x3b8   : > { %2862 = vmatprep.subr.mxu1 %v1570_v20  ;;  %v1476_v22 = vsub.f32 %v3885_v27, %v1444_v21  ;;  %v1441_v23 = vpop.xlane.xlu0 %1440 }
 0x3b9   : > { %3090 = vpow2.f32 %v1509_v19  ;;  %v1475_v24 = vsub.f32 %v3889_v29, %v1441_v23 }
 0x3ba   : > { %v3083_v25 = vpop.eup %3082  ;;  %3092 = vpow2.f32 %v1511_v17  ;;  %v1499_v26 = vmul.f32 1.442695, %v1476_v22 }
 0x3bb   : > { %v3085_v28 = vpop.eup %3084  ;;  %v1497_v30 = vmul.f32 1.442695, %v1475_v24  ;;  %v1456_v32 = vpop.xlane.xlu1 %1455  ;;  %v1544_v34 = vsel %vm595_vm3, %v3083_v25, 0.0  ;;  %v2329_v24 = vld [vmem:[#allocation13] sm:$0xff] }
 0x3bc   : > { %v1480_v35 = vsub.f32 %v3893_v31, %v1456_v32  ;;  %v1453_v18 = vpop.xlane.xlu0 %1452  ;;  %1545 = vadd.xlane.f32.xlu0 %v1544_v34  ;;  %v1541_v36 = vsel %vm595_vm3, %v3085_v28, 0.0 }
 0x3bd   : > { %3094 = vpow2.f32 %v1497_v30  ;;  %v1479_v27 = vsub.f32 %v3897_v33, %v1453_v18  ;;  %1542 = vadd.xlane.f32.xlu1 %v1541_v36  ;;  %v2331_v18 = vld [vmem:[#allocation13 + $0x10] sm:$0xff]  ;;  %v2332_v36 = vld [vmem:[#allocation13 + $0x18] sm:$0xff] }
 0x3be   : > { %3096 = vpow2.f32 %v1499_v26  ;;  %v1507_v29 = vmul.f32 1.442695, %v1480_v35 }
 0x3bf   : > { %v3087_v37 = vpop.eup %3086  ;;  %v1505_v38 = vmul.f32 1.442695, %v1479_v27  ;;  %v1468_v41 = vpop.xlane.xlu1 %1467 }
 0x3c0   : > { %v3089_v44 = vpop.eup %3088  ;;  %v1484_v45 = vsub.f32 %v3909_v39, %v1468_v41  ;;  %2849 = vmatprep.mubr.msk.f32.mxu0 %vm595_vm3, %v3087_v37  ;;  %1524 = vadd.xlane.f32.xlu0 %v1523_v43  ;;  %v1465_v31 = vpop.xlane.xlu0 %1464  ;;  %v1529_v61 = vsel %vm595_vm3, %v3087_v37, 0.0 }
 0x3c1   : > { %3098 = vpow2.f32 %v1505_v38  ;;  %v1483_v46 = vsub.f32 %v3911_v42, %v1465_v31  ;;  %2850 = vmatmul.mubr.msk.f32.vlgmr.msra.gmra.mrb[10].mxu0 %vm595_vm3, %v3089_v44  ;;  %v1532_v39 = vsel %vm595_vm3, %v3089_v44, 0.0  ;;  %v2934_v38 = vpack.c.bf16 %v2332_v36, %v2331_v18  ;;  %v2333_v44 = vld [vmem:[#allocation13 + $0x20] sm:$0xff] }
 0x3c2   : > { %3100 = vpow2.f32 %v1507_v29  ;;  %v1515_v33 = vmul.f32 1.442695, %v1484_v45  ;;  %2858 = vmatpush3.msra.mxu0 %v3931_v56  ;;  %2859 = vmatprep.mubr.msk.f32.mxu0 %vm595_vm3, %v3085_v28  ;;  %v2334_v45 = vld [vmem:[#allocation13 + $0x28] sm:$0xff] }
 0x3c3   : > { %v3091_v47 = vpop.eup %3090  ;;  %v1513_v48 = vmul.f32 1.442695, %v1483_v46  ;;  %v624_v49 = vpop.permute.xlu1 %623 }
 0x3c4   : > { %v3093_v50 = vpop.eup %3092  ;;  %633 = vst.msk [vmem:[#allocation3 + $0x38] sm:$0xff] %vm595_vm3, %v624_v49  ;;  %1533 = vadd.xlane.f32.xlu0 %v1532_v39  ;;  %v621_v51 = vpop.permute.xlu0 %620  ;;  %v1553_v42 = vsel %vm595_vm3, %v3091_v47, 0.0 }
 0x3c5   : > { %3102 = vpow2.f32 %v1513_v48  ;;  %632 = vst.msk [vmem:[#allocation3 + $0x30] sm:$0xff] %vm595_vm3, %v621_v51  ;;  %2860 = vmatmul.mubr.msk.f32.vlgmr.msra.gmra.mrb[12].mxu0 %vm595_vm3, %v3083_v25  ;;  %1554 = vadd.xlane.f32.xlu1 %v1553_v42  ;;  %v1556_v53 = vsel %vm595_vm3, %v3093_v50, 0.0  ;;  %v2330_v25 = vld [vmem:[#allocation13 + $0x8] sm:$0xff]  ;;  %v2335_v51 = vld [vmem:[#allocation13 + $0x30] sm:$0xff]  ;;  %v2336_v42 = vld [vmem:[#allocation13 + $0x38] sm:$0xff] }
 0x3c6   : > { %3104 = vpow2.f32 %v1515_v33  ;;  %2869 = vmatprep.mubr.msk.f32.mxu0 %vm595_vm3, %v3091_v47  ;;  %v2930_v30 = vpack.c.bf16 %v2330_v25, %v2329_v24  ;;  %v2938_v33 = vpack.c.bf16 %v2334_v45, %v2333_v44 }
 0x3c7   : > { %v3095_v52 = vpop.eup %3094 }
 0x3c8   : > { %v3097_v56 = vpop.eup %3096  ;;  %2854 = vmatprep.mubr.msk.f32.mxu1 %vm595_vm3, %v3095_v52  ;;  %1557 = vadd.xlane.f32.xlu0 %v1556_v53  ;;  %v1535_v57 = vsel %vm595_vm3, %v3095_v52, 0.0 }
 0x3c9   : > { %2855 = vmatmul.mubr.msk.f32.vlgmr.msra.gmra.mrb[16].mxu1 %vm595_vm3, %v3097_v56  ;;  %1536 = vadd.xlane.f32.xlu1 %v1535_v57  ;;  %v1538_v2 = vsel %vm595_vm3, %v3097_v56, 0.0  ;;  %v2942_v57 = vpack.c.bf16 %v2336_v42, %v2335_v51 }
 0x3ca   : > { %2863 = vmatpush3.msra.mxu1 %v1570_v20 }
 0x3cb   : > { %v3099_v58 = vpop.eup %3098  ;;  %v1572_v59 = vld [vmem:[#allocation3 + $0x38] sm:$0xff] }
 0x3cc   : > { %v3101_v60 = vpop.eup %3100  ;;  %2864 = vmatprep.mubr.msk.f32.mxu1 %vm595_vm3, %v3099_v58  ;;  %2872 = vmatprep.subr.mxu1 %v1572_v59  ;;  %v1547_v62 = vsel %vm595_vm3, %v3099_v58, 0.0  ;;  %v1571_v63 = vld [vmem:[#allocation3 + $0x30] sm:$0xff] }
 0x3cd   : > { %1530 = vadd.xlane.f32.xlu0 %v1529_v61  ;;  %2865 = vmatmul.mubr.msk.f32.vlgmr.msra.gmra.mrb[18].mxu1 %vm595_vm3, %v3101_v60  ;;  %v1550_v4 = vsel %vm595_vm3, %v3101_v60, 0.0 }
 0x3ce   : > { %1548 = vadd.xlane.f32.xlu1 %v1547_v62  ;;  %2867 = vmatprep.subr.mxu0 %v1571_v63 }
 0x3cf   : > { %v3103_v0 = vpop.eup %3102  ;;  %2873 = vmatpush3.msra.mxu1 %v1572_v59  ;;  %2868 = vmatpush3.msra.mxu0 %v1571_v63 }
 0x3d0   : > { %v3105_v1 = vpop.eup %3104  ;;  %2870 = vmatmul.mubr.msk.f32.vlgmr.msra.gmra.mrb[14].mxu0 %vm595_vm3, %v3093_v50  ;;  %2874 = vmatprep.mubr.msk.f32.mxu1 %vm595_vm3, %v3103_v0  ;;  %v1559_v3 = vsel %vm595_vm3, %v3103_v0, 0.0 }
 0x3d1   : > { %1539 = vadd.xlane.f32.xlu0 %v1538_v2  ;;  %2875 = vmatmul.mubr.msk.f32.vlgmr.msra.gmra.mrb[20].mxu1 %vm595_vm3, %v3105_v1  ;;  %v1562_v40 = vsel %vm595_vm3, %v3105_v1, 0.0 }
 0x3d2   : > { %1560 = vadd.xlane.f32.xlu1 %v1559_v3  ;;  %2931 = vmatprep.subr.bf16.mxu0 %v2930_v30 }
 0x3d3   : > { %2933 = vmatpush3.bf16.msra.mxu0 %v2930_v30 }
 0x3d4   : > { %2935 = vmatprep.subr.bf16.mxu0 %v2934_v38 }
 0x3d5   : > { %1551 = vadd.xlane.f32.xlu0 %v1550_v4 }
 0x3d6   : > { %1518 = vadd.xlane.f32.xlu1 %v1517_v5 }
 0x3d7   : > { %2937 = vmatpush3.bf16.msra.mxu0 %v2934_v38 }
 0x3d8   : > { %2939 = vmatprep.subr.bf16.mxu0 %v2938_v33 }
 0x3d9   : > { %1563 = vadd.xlane.f32.xlu0 %v1562_v40 }
 0x3db   : > { %2941 = vmatpush3.bf16.msra.mxu0 %v2938_v33 }
 0x3dc   : > { %2943 = vmatprep.subr.bf16.mxu0 %v2942_v57 }
 0x3dd   : > { %1521 = vadd.xlane.f32.xlu0 %v1520_v6 }
 0x3df   : > { %2945 = vmatpush3.bf16.msra.mxu0 %v2942_v57 }
 0x40e   : > { %v3990_v7 = vpop.f32.mrb[8].mxu0 }
 0x40f   : > { %v3992_v8 = vpop.f32.mrb[9].mxu0 }
 0x442   : > { %v1528_v11 = vpop.xlane.xlu1 %1527 }
 0x443   : > { %3106 = vrcp.f32 %v1528_v11 }
 0x449   : > { %v1546_v9 = vpop.xlane.xlu0 %1545 }
 0x44a   : > { %v1543_v54 = vpop.xlane.xlu1 %1542 }
 0x44d   : > { %v1525_v10 = vpop.xlane.xlu0 %1524  ;;  %v3107_v14 = vpop.eup %3106 }
 0x44e   : > { %3108 = vrcp.f32 %v1525_v10 }
 0x451   : > { %v1534_v12 = vpop.xlane.xlu0 %1533 }
 0x452   : > { %3110 = vrcp.f32 %v1534_v12  ;;  %v1555_v19 = vpop.xlane.xlu1 %1554 }
 0x455   : > { %v1558_v13 = vpop.xlane.xlu0 %1557 }
 0x456   : > { %v1537_v23 = vpop.xlane.xlu1 %1536 }
 0x458   : > { %v3109_v17 = vpop.eup %3108 }
 0x45a   : > { %v1531_v15 = vpop.xlane.xlu0 %1530 }
 0x45b   : > { %3112 = vrcp.f32 %v1531_v15  ;;  %v1549_v29 = vpop.xlane.xlu1 %1548 }
 0x45c   : > { %v3111_v26 = vpop.eup %3110 }
 0x45e   : > { %v1540_v22 = vpop.xlane.xlu0 %1539 }
 0x45f   : > { %3114 = vrcp.f32 %v1540_v22  ;;  %v1561_v53 = vpop.xlane.xlu1 %1560 }
 0x460   : > { %3116 = vrcp.f32 %v1537_v23 }
 0x461   : > { %3118 = vrcp.f32 %v1546_v9 }
 0x462   : > { %3120 = vrcp.f32 %v1543_v54  ;;  %v1552_v35 = vpop.xlane.xlu0 %1551 }
 0x463   : > { %3122 = vrcp.f32 %v1552_v35 }
 0x464   : > { %3124 = vrcp.f32 %v1549_v29 }
 0x465   : > { %v3113_v27 = vpop.eup %3112  ;;  %3126 = vrcp.f32 %v1558_v13 }
 0x466   : > { %3128 = vrcp.f32 %v1555_v19  ;;  %v1564_v50 = vpop.xlane.xlu0 %1563 }
 0x467   : > { %3130 = vrcp.f32 %v1564_v50 }
 0x468   : > { %3132 = vrcp.f32 %v1561_v53 }
 0x469   : > { %v3115_v31 = vpop.eup %3114 }
 0x46a   : > { %v3117_v47 = vpop.eup %3116 }
 0x46b   : > { %v3119_v52 = vpop.eup %3118 }
 0x46c   : > { %v3121_v58 = vpop.eup %3120 }
 0x46d   : > { %v3123_v63 = vpop.eup %3122 }
 0x46e   : > { %v3125_v2 = vpop.eup %3124 }
 0x46f   : > { %v3127_v40 = vpop.eup %3126 }
 0x470   : > { %v3129_v6 = vpop.eup %3128 }
 0x471   : > { %v3131_v11 = vpop.eup %3130 }
 0x472   : > { %v3133_v12 = vpop.eup %3132 }
 0x489   : > { %v2846_v16 = vpop.f32.mrb[14].mxu1 }
 0x48a   : > { %v2240_v55 = vmul.f32 %v3107_v14, %v2846_v16  ;;  %v1726_v20 = vpop.f32.mrb[15].mxu1  ;;  %v1519_v14 = vpop.xlane.xlu1 %1518 }
 0x48b   : > { %v2239_v21 = vmul.f32 %v3109_v17, %v1726_v20  ;;  %v1522_v17 = vpop.xlane.xlu0 %1521  ;;  %3134 = vrcp.f32 %v1519_v14 }
 0x48c   : > { %2257 = vrot.lane.b32.xlu0 %v2240_v55, %s3428_s21  ;;  %3136 = vrcp.f32 %v1522_v17 }
 0x48d   : > { %2255 = vrot.lane.b32.xlu1 %v2239_v21, %s3428_s21 }
 0x494   : > { %v2851_v28 = vpop.f32.mrb[10].mxu0 }
 0x495   : > { %v2242_v32 = vmul.f32 %v3111_v26, %v2851_v28  ;;  %v1807_v34 = vpop.f32.mrb[11].mxu0  ;;  %v3135_v24 = vpop.eup %3134 }
 0x496   : > { %v2241_v41 = vmul.f32 %v3113_v27, %v1807_v34  ;;  %v3137_v25 = vpop.eup %3136  ;;  %v2237_v30 = vmul.f32 %v3135_v24, %v3992_v8 }
 0x497   : > { %2265 = vrot.lane.b32.xlu1 %v2242_v32, %s3429_s2  ;;  %v2238_v32 = vmul.f32 %v3137_v25, %v3990_v7 }
 0x498   : > { %v2861_v37 = vpop.f32.mrb[12].mxu0 }
 0x499   : > { %v1969_v43 = vpop.f32.mrb[13].mxu0  ;;  %v2246_v59 = vmul.f32 %v3119_v52, %v2861_v37 }
 0x49a   : > { %v2245_v61 = vmul.f32 %v3121_v58, %v1969_v43 }
 0x49b   : > { %2263 = vrot.lane.b32.xlu1 %v2241_v41, %s3429_s2  ;;  %s3316_s2 = scalar_lea.vmem %s3315_s16, 512 }
 0x49c   : > { %v2856_v46 = vpop.f32.mrb[16].mxu1  ;;  %p3318_p10 = scmp.lt.s32.totalorder %s3316_s2, %s3310_s27 }
 0x49d   : > { %v2244_v48 = vmul.f32 %v3115_v31, %v2856_v46  ;;  %v1888_v49 = vpop.f32.mrb[17].mxu1 }
 0x49e   : > { %v2243_v39 = vmul.f32 %v3117_v47, %v1888_v49  ;;  %p3319_p6 = por %p3318_p10, %p3317_p3 }
 0x49f   : > { %2273 = vrot.lane.b32.xlu1 %v2244_v48, %s3430_s15  ;;  %v2656_v48 = vld [vmem:[%s4073_s6] ss:$0 sm:$0xff] }
 0x4a0   : > { %v2866_v56 = vpop.f32.mrb[18].mxu1  ;;  %2271 = vrot.lane.b32.xlu0 %v2243_v39, %s3430_s15  ;;  %p3320_p5 = pnand %p3319_p6, %p3313_p8 }
 0x4a1   : > { %v2050_v60 = vpop.f32.mrb[19].mxu1  ;;  %v2248_v3 = vmul.f32 %v3123_v63, %v2866_v56 }
 0x4a2   : > { %v2247_v5 = vmul.f32 %v3125_v2, %v2050_v60 }
 0x4a3   : > { %v2871_v62 = vpop.f32.mrb[14].mxu0  ;;  %2281 = vrot.lane.b32.xlu1 %v2246_v59, %s3431_s17 }
 0x4a4   : > { %v2131_v0 = vpop.f32.mrb[15].mxu0  ;;  %2279 = vrot.lane.b32.xlu0 %v2245_v61, %s3431_s17  ;;  %v2876_v1 = vpop.f32.mrb[20].mxu1  ;;  %v2250_v9 = vmul.f32 %v3127_v40, %v2871_v62 }
 0x4a5   : > { %v2212_v4 = vpop.f32.mrb[21].mxu1  ;;  %v2249_v10 = vmul.f32 %v3129_v6, %v2131_v0  ;;  %v2252_v13 = vmul.f32 %v3131_v11, %v2876_v1 }
 0x4a6   : > { %v2251_v54 = vmul.f32 %v3133_v12, %v2212_v4 }
 0x4a7   : > { %2289 = vrot.lane.b32.xlu1 %v2248_v3, %s3432_s18 }
 0x4a8   : > { %2287 = vrot.lane.b32.xlu0 %v2247_v5, %s3432_s18 }
 0x4ab   : > { %2297 = vrot.lane.b32.xlu1 %v2250_v9, %s3433_s10 }
 0x4ac   : > { %2295 = vrot.lane.b32.xlu0 %v2249_v10, %s3433_s10 }
 0x4af   : > { %2305 = vrot.lane.b32.xlu1 %v2252_v13, %s3434_s19 }
 0x4b0   : > { %2303 = vrot.lane.b32.xlu0 %v2251_v54, %s3434_s19 }
 0x4fe   : > { %v2258_v55 = vpop.permute.xlu0 %2257 }
 0x4ff   : > { %v2256_v15 = vpop.permute.xlu1 %2255  ;;  %v2310_v18 = vsel %vm595_vm3, %v2238_v32, %v2258_v55 }
 0x500   : > { %v2309_v34 = vsel %vm595_vm3, %v2237_v30, %v2256_v15 }
 0x509   : > { %v2266_v16 = vpop.permute.xlu1 %2265 }
 0x50a   : > { %v2313_v29 = vsel %vm2311_vm4, %v2310_v18, %v2266_v16 }
 0x50d   : > { %v2264_v19 = vpop.permute.xlu1 %2263 }
 0x50e   : > { %v2312_v36 = vsel %vm2311_vm4, %v2309_v34, %v2264_v19 }
 0x511   : > { %v2274_v20 = vpop.permute.xlu1 %2273 }
 0x512   : > { %v2272_v21 = vpop.permute.xlu0 %2271  ;;  %v2316_v38 = vsel %vm2314_vm5, %v2313_v29, %v2274_v20 }
 0x513   : > { %v2315_v37 = vsel %vm2314_vm5, %v2312_v36, %v2272_v21 }
 0x515   : > { %v2282_v22 = vpop.permute.xlu1 %2281 }
 0x516   : > { %v2280_v23 = vpop.permute.xlu0 %2279  ;;  %v2319_v8 = vsel %vm2317_vm6, %v2316_v38, %v2282_v22 }
 0x517   : > { %v2318_v41 = vsel %vm2317_vm6, %v2315_v37, %v2280_v23 }
 0x519   : > { %v2290_v26 = vpop.permute.xlu1 %2289 }
 0x51a   : > { %v2288_v28 = vpop.permute.xlu0 %2287  ;;  %v2322_v44 = vsel %vm2320_vm7, %v2319_v8, %v2290_v26 }
 0x51b   : > { %v2321_v7 = vsel %vm2320_vm7, %v2318_v41, %v2288_v28 }
 0x51d   : > { %v2298_v35 = vpop.permute.xlu1 %2297 }
 0x51e   : > { %v2296_v27 = vpop.permute.xlu0 %2295  ;;  %v2325_v46 = vsel %vm423_vm2, %v2322_v44, %v2298_v35 }
 0x51f   : > { %v2324_v45 = vsel %vm423_vm2, %v2321_v7, %v2296_v27 }
 0x521   : > { %v2306_v43 = vpop.permute.xlu1 %2305 }
 0x522   : > { %v2304_v31 = vpop.permute.xlu0 %2303  ;;  %v2328_v47 = vsel %vm2326_vm8, %v2325_v46, %v2306_v43 }
 0x523   : > { %v2327_v33 = vsel %vm2326_vm8, %v2324_v45, %v2304_v31 }
 0x524   : > { %2893 = vmatprep.mubr.msk.f32.mxu0 %vm644_vm1, %v2327_v33 }
 0x525   : > { %2894 = vmatmul.mubr.msk.f32.vlgmr.msra.gmra.mrb[16].mxu0 %vm644_vm1, %v2328_v47 }
 0x5f8   : > { %v2895_v49 = vpop.f32.mrb[16].mxu0 }
 0x5f9   : > { %v2422_v39 = vadd.f32 %v2895_v49, %v2656_v48  ;;  %v2416_v50 = vpop.f32.mrb[17].mxu0 }
 0x5fa   : > { %v2417_v51 = vadd.f32 %v2656_v48, %v2416_v50 }
 0x5fb   : > { %2426 = vst.msk [vmem:[%s409_s11 + $0x8] sm:$0xff] %vm644_vm1, %v2422_v39 }
 0x5fc   : > { %2425 = vst.msk [vmem:[%s409_s11] sm:$0xff] %vm644_vm1, %v2417_v51 }
 0x5fd   : > { %3323 = shalt.err (!%p3320_p5)
}
 0x5fe   : > { %s3324_s15 = scalar_lea.hbm %s4015_s22, 256  ;;  %s3328_s10 = scalar_lea.hbm %s4112_s20, 512 }
 0x5ff   : > { %p3325_p7 = scmp.ne.s32.totalorder %s4015_s22, %s3324_s15  ;;  %p3329_p9 = scmp.lt.u32.totalorder %s4015_s22, %s4112_s20 }
 0x600   : > { %p3330_p0 = scmp.lt.u32.totalorder %s3328_s10, %s3324_s15  ;;  %p3332_p13 = scmp.lt.u32.totalorder %s3324_s15, %s4015_s22 }
 0x601   : > { %p3326_p12 = pnand %p3325_p7, %p4113_p4 }
 0x602   : > { %p3331_p2 = por %p3330_p0, %p3329_p9 }
 0x603   : > { %p3327_p11 = pneg %p3326_p12 }
 0x604   : > { %p3333_p1 = por %p3332_p13, %p3331_p2 }
 0x606   : > { %p3334_p8 = pnand %p3333_p1, %p3327_p11 }
 0x608   : > { %3337 = shalt.err (!%p3334_p8)
}
 0x609   : > { %s3436_s3 = smov 128  }
 0x60a   : > { %2966 = dma.vmem_to_hbm [thread:$0]  (%p4113_p4), %s4010_s7, 256, %s4015_s22, %s2428_s14, %s3436_s3, %s3436_s3, %s3428_s21  }
 0x60b PF: > { %s4114_s11 = sld [smem:[#allocation22_spill]]  ;;  %s4115_s30 = sld [smem:[#allocation23_spill]] }
 0x60c   : > { %p4117_p10 = scmp.ge.s32.totalorder %s3408_s29, 2 }
 0x611   : > { %s2458_s9 = sand.u32 1, %s4114_s11   ;;  %p4116_p3 = scmp.ne.s32.totalorder %s4115_s30, 0 }
 0x612   : > { %s2459_s23 = scalar_lea.sflag [#allocation6], %s2458_s9 }
 0x613   : > { %p2989_p6 = pnand %p4117_p10, %p4116_p3 }
 0x615   : > { %3383 = dma.done.wait (!%p2989_p6), %s2459_s23, 256  }
 0x616   : > { %3385 = vsyncadd (!%p2989_p6), %s2459_s23, 4294967040  ;;  %s28_s29 = sadd.s32 1, %s3408_s29   ;;  %s4118_s24 = smov %s3392_s25 }
 0x617   : > { %p25_p5 = scmp.ge.s32.totalorder %s28_s29, 4   ;;  %s4119_s25 = smov %s3396_s26 }
 0x618   : > { %s4120_s26 = smov %s3669_s12  ;;  %s4121_s27 = smov %s3404_s28 }
 0x619   : > { %s4122_s28 = smov %s4124_s8  ;;  %27 = sbr.rel (!%p25_p5) target bundleno = 16 (0x10), region = 126 }
 0x620   :  { %2464 = vsyncpa [#allocation5], 1 }
 0x621   :  { %2466 = vsyncpa [#allocation5 + $0x1], 1 }
 0x622   :  { %2467 = vsyncpa [#allocation8], 1 }
 0x623   :  { %2469 = vsyncpa [#allocation8 + $0x1], 1 }
 0x624   :  { %2470 = vsyncpa [#allocation11], 1 }
 0x625   :  { %2471 = vsyncpa [#allocation14], 1 }
 0x626   :  { %2472 = vsyncpa [#allocation6], 1 }
 0x627   :  { %2474 = vsyncpa [#allocation6 + $0x1], 1 }

</bundles_post_ra>
